<compile_context>
chip_gen: v7x
topology: tpu7x:2x2x1
jax: 0.10.0
libtpu: 0.0.40
codegen_flags: <defaults>
</compile_context>

<pallas_src>
import functools

import jax
import jax.numpy as jnp
from jax.experimental import pallas as pl
from jax.experimental.pallas import tpu as pltpu

LANE = 128


def _device_vmem_bytes():
    try:
        return int(pltpu.get_tpu_info().vmem_capacity_bytes)
    except Exception:
        return 64 * 1024 * 1024  # conservative (v7x-sized) fallback


_VMEM_CAP = _device_vmem_bytes()
if _VMEM_CAP >= 100 * 1024 * 1024:      # v5e / v6e: 128 MiB physical VMEM
    VMEM_LIMIT = 96 * 1024 * 1024
    DEFAULT_TILE = 1024
else:                                    # v7x (64 MiB) or unknown
    VMEM_LIMIT = 48 * 1024 * 1024
    DEFAULT_TILE = 512


def _round_up(v, m):
    return ((v + m - 1) // m) * m


def _pad2d(x, rows, cols):
    r, c = x.shape
    return jnp.pad(x, ((0, rows - r), (0, cols - c)))


def _const_spec(shape, index_map):
    """BlockSpec for a constant-block-index operand; single-buffered when supported."""
    if hasattr(pl, "Buffered"):
        try:
            return pl.BlockSpec(shape, index_map, pipeline_mode=pl.Buffered(1))
        except Exception:
            pass
    return pl.BlockSpec(shape, index_map)


# --------------------------------------------------------------------------------------
# Tiled SAGE layer:  out = relu?( ((A @ H) * inv_deg) @ Wl + H @ Wr + b )
#   - A streamed (tm, tk) bf16 count tiles, grid = (row_tiles, k_tiles), k last & arbitrary
#   - H streamed via two specs (aggregation k-block + root row-block), f32 accumulator,
#     pl.when init/finalize, fused [agg | H_root] @ W_cat epilogue matmul (K = 2*f_in)
# --------------------------------------------------------------------------------------
def _sage_layer_kernel(a_ref, hk_ref, hi_ref, invdeg_ref, wcat_ref, b_ref,
                       out_ref, acc_ref, *, apply_relu):
    k = pl.program_id(1)
    nk = pl.num_programs(1)

    @pl.when(k == 0)
    def _():
        acc_ref[...] = jnp.zeros_like(acc_ref)

    acc_ref[...] += jnp.dot(a_ref[...], hk_ref[...], preferred_element_type=jnp.float32)

    @pl.when(k == nk - 1)
    def _():
        agg = (acc_ref[...] * invdeg_ref[...]).astype(jnp.bfloat16)     # mean in f32, then bf16
        hcat = jnp.concatenate([agg, hi_ref[...]], axis=-1)             # (tm, 2*f_in)
        out = (jnp.dot(hcat, wcat_ref[...], preferred_element_type=jnp.float32)
               + b_ref[...])
        if apply_relu:
            out = jnp.maximum(out, 0.0)
        out_ref[...] = out.astype(out_ref.dtype)


def _sage_layer(a_pad, h_pad, invdeg_pad, wcat, b, *, tm, tk, apply_relu):
    n_pad = a_pad.shape[0]
    f_in = h_pad.shape[1]
    f_out = wcat.shape[1]
    grid = (n_pad // tm, n_pad // tk)

    kernel = functools.partial(_sage_layer_kernel, apply_relu=apply_relu)

    flops = 2 * n_pad * n_pad * f_in + 2 * n_pad * (2 * f_in) * f_out
    bytes_accessed = (2 * n_pad * n_pad                       # A stream (bf16)
                      + 2 * (grid[0] + 1) * n_pad * f_in      # H agg stream + root tiles
                      + 4 * n_pad                             # inv_deg (f32)
                      + 2 * 2 * f_in * f_out + 4 * f_out      # W_cat + bias
                      + 2 * n_pad * f_out)                    # output

    return pl.pallas_call(
        kernel,
        out_shape=jax.ShapeDtypeStruct((n_pad, f_out), jnp.bfloat16),
        grid_spec=pltpu.PrefetchScalarGridSpec(
            num_scalar_prefetch=0,
            grid=grid,
            in_specs=[
                pl.BlockSpec((tm, tk), lambda i, k: (i, k)),          # A: streamed tiles
                pl.BlockSpec((tk, f_in), lambda i, k: (k, 0)),        # H: aggregation k-block
                pl.BlockSpec((tm, f_in), lambda i, k: (i, 0)),        # H: root row-block
                pl.BlockSpec((tm, 1), lambda i, k: (i, 0)),           # inv_deg (f32)
                _const_spec((2 * f_in, f_out), lambda i, k: (0, 0)),  # W_cat (single-buffered)
                _const_spec((1, f_out), lambda i, k: (0, 0)),         # bias  (single-buffered)
            ],
            out_specs=pl.BlockSpec((tm, f_out), lambda i, k: (i, 0)),
            scratch_shapes=[pltpu.VMEM((tm, f_in), jnp.float32)],
        ),
        compiler_params=pltpu.CompilerParams(
            dimension_semantics=("parallel", "arbitrary"),
            vmem_limit_bytes=VMEM_LIMIT,
        ),
        cost_estimate=pl.CostEstimate(flops=flops, transcendentals=0,
                                      bytes_accessed=bytes_accessed),
    )(a_pad, h_pad, h_pad, invdeg_pad, wcat, b)


# --------------------------------------------------------------------------------------
# Layer 3 with the mean-pool fused into the finalize: emits per-row-tile pooled partials
# P01[:, rows_i] @ H3[rows_i]  (f32).  Reduction over row tiles + Linear done in wrapper.
# --------------------------------------------------------------------------------------
def _sage_layer3_pool_kernel(a_ref, hk_ref, hi_ref, invdeg_ref, wcat_ref, b_ref, p_ref,
                             pool_ref, acc_ref):
    k = pl.program_id(1)
    nk = pl.num_programs(1)

    @pl.when(k == 0)
    def _():
        acc_ref[...] = jnp.zeros_like(acc_ref)

    acc_ref[...] += jnp.dot(a_ref[...], hk_ref[...], preferred_element_type=jnp.float32)

    @pl.when(k == nk - 1)
    def _():
        agg = (acc_ref[...] * invdeg_ref[...]).astype(jnp.bfloat16)
        hcat = jnp.concatenate([agg, hi_ref[...]], axis=-1)
        h3 = (jnp.dot(hcat, wcat_ref[...], preferred_element_type=jnp.float32)
              + b_ref[...])                                            # no relu on conv3
        pool_ref[0] = jnp.dot(p_ref[...], h3.astype(jnp.bfloat16),
                              preferred_element_type=jnp.float32)


def _sage_layer3_pool(a_pad, h_pad, invdeg_pad, wcat, b, p_pad, *, tm, tk):
    n_pad = a_pad.shape[0]
    f_in = h_pad.shape[1]
    f_out = wcat.shape[1]
    g_pad = p_pad.shape[0]
    row_tiles = n_pad // tm
    grid = (row_tiles, n_pad // tk)

    return pl.pallas_call(
        _sage_layer3_pool_kernel,
        out_shape=jax.ShapeDtypeStruct((row_tiles, g_pad, f_out), jnp.float32),
        grid_spec=pltpu.PrefetchScalarGridSpec(
            num_scalar_prefetch=0,
            grid=grid,
            in_specs=[
                pl.BlockSpec((tm, tk), lambda i, k: (i, k)),
                pl.BlockSpec((tk, f_in), lambda i, k: (k, 0)),
                pl.BlockSpec((tm, f_in), lambda i, k: (i, 0)),
                pl.BlockSpec((tm, 1), lambda i, k: (i, 0)),
                _const_spec((2 * f_in, f_out), lambda i, k: (0, 0)),
                _const_spec((1, f_out), lambda i, k: (0, 0)),
                pl.BlockSpec((g_pad, tm), lambda i, k: (0, i)),       # binary pool rows
            ],
            out_specs=pl.BlockSpec((1, g_pad, f_out), lambda i, k: (i, 0, 0)),
            scratch_shapes=[pltpu.VMEM((tm, f_in), jnp.float32)],
        ),
        compiler_params=pltpu.CompilerParams(
            dimension_semantics=("parallel", "arbitrary"),
            vmem_limit_bytes=VMEM_LIMIT,
        ),
    )(a_pad, h_pad, h_pad, invdeg_pad, wcat, b, p_pad)


# --------------------------------------------------------------------------------------
# Small-graph fast path: all 3 layers + mean pool + linear in ONE no-grid pallas_call.
# --------------------------------------------------------------------------------------
def _fused_forward_kernel(a_ref, x_ref, invdeg_ref, p_ref, invcnt_ref,
                          w1_ref, b1_ref, w2_ref, b2_ref, w3_ref, b3_ref,
                          wlin_ref, blin_ref, out_ref):
    a = a_ref[...]                 # (n_pad, n_pad) bf16 counts (exact small ints)
    invdeg = invdeg_ref[...]       # (n_pad, 1) f32

    def sage(h_bf16, w_ref, b_ref, relu):
        agg = jnp.dot(a, h_bf16, preferred_element_type=jnp.float32) * invdeg
        hcat = jnp.concatenate([agg.astype(jnp.bfloat16), h_bf16], axis=-1)
        o = jnp.dot(hcat, w_ref[...], preferred_element_type=jnp.float32) + b_ref[...]
        if relu:
            o = jnp.maximum(o, 0.0)
        return o

    h1 = sage(x_ref[...], w1_ref, b1_ref, True).astype(jnp.bfloat16)
    h2 = sage(h1, w2_ref, b2_ref, True).astype(jnp.bfloat16)
    h3 = sage(h2, w3_ref, b3_ref, False)
    # global mean pool (binary P, 1/count applied in f32); dropout(training=False) == id
    g = (jnp.dot(p_ref[...], h3.astype(jnp.bfloat16), preferred_element_type=jnp.float32)
         * invcnt_ref[...])
    out_ref[...] = (jnp.dot(g.astype(jnp.bfloat16), wlin_ref[...],
                            preferred_element_type=jnp.float32) + blin_ref[...])


def _fused_forward(a_pad, x_pad, invdeg_pad, p_pad, invcnt_pad,
                   w1c, b1_p, w2c, b2_p, w3c, b3_p, wlin_p, blin_p):
    g_pad = p_pad.shape[0]
    c_p = wlin_p.shape[1]
    return pl.pallas_call(
        _fused_forward_kernel,
        out_shape=jax.ShapeDtypeStruct((g_pad, c_p), jnp.float32),
        compiler_params=pltpu.CompilerParams(vmem_limit_bytes=VMEM_LIMIT),
    )(a_pad, x_pad, invdeg_pad, p_pad, invcnt_pad,
      w1c, b1_p, w2c, b2_p, w3c, b3_p, wlin_p, blin_p)


# --------------------------------------------------------------------------------------
# Glue
# --------------------------------------------------------------------------------------
def build_graph_operators(n, edge_index, batch, num_graphs):
    """Dense edge-count adjacency, per-row 1/deg, binary pool one-hot, per-graph 1/count."""
    src, dst = edge_index[0], edge_index[1]
    counts = jnp.zeros((n, n), jnp.float32).at[dst, src].add(1.0)     # exact small ints
    deg = jnp.sum(counts, axis=1, keepdims=True)
    inv_deg = 1.0 / jnp.maximum(deg, 1.0)                             # applied in f32 in-kernel

    onehot = (batch[None, :] == jnp.arange(num_graphs)[:, None]).astype(jnp.float32)
    g_cnt = jnp.sum(onehot, axis=1, keepdims=True)
    inv_cnt = 1.0 / jnp.maximum(g_cnt, 1.0)
    return counts, inv_deg, onehot, inv_cnt


def graphsage_forward(x, edge_index, batch, params, num_graphs, *, tile=None,
                      force_tiled=False):
    n, f_in = x.shape
    (w1l, w1r, b1, w2l, w2r, b2, w3l, w3r, b3, wlin, blin) = params
    num_classes = wlin.shape[1]
    hid = wlin.shape[0]

    tile = DEFAULT_TILE if tile is None else tile
    n_pad = _round_up(n, LANE)
    tm = tk = min(tile, n_pad)
    n_pad = _round_up(n_pad, tm)

    f_in_p = _round_up(f_in, LANE)
    h1_p = _round_up(w1l.shape[1], LANE)
    h2_p = _round_up(w2l.shape[1], LANE)
    h3_p = _round_up(w3l.shape[1], LANE)
    c_p = _round_up(num_classes, LANE)
    g_pad = _round_up(num_graphs, 8)

    counts, inv_deg, onehot, inv_cnt = build_graph_operators(n, edge_index, batch, num_graphs)

    a_pad = _pad2d(counts, n_pad, n_pad).astype(jnp.bfloat16)   # exact values, normalization in f32
    invdeg_pad = _pad2d(inv_deg, n_pad, 1)                      # f32
    p_pad = _pad2d(onehot, g_pad, n_pad).astype(jnp.bfloat16)   # binary, exact
    invcnt_pad = _pad2d(inv_cnt, g_pad, 1)                      # f32

    x_pad = _pad2d(x, n_pad, f_in_p).astype(jnp.bfloat16)

    def cat(wl, wr, fi_p, fo_p):   # fused [Wl; Wr] projection weight, K = 2*fi_p
        return jnp.concatenate([_pad2d(wl, fi_p, fo_p),
                                _pad2d(wr, fi_p, fo_p)], axis=0).astype(jnp.bfloat16)

    w1c, b1_p = cat(w1l, w1r, f_in_p, h1_p), _pad2d(b1, 1, h1_p)
    w2c, b2_p = cat(w2l, w2r, h1_p, h2_p), _pad2d(b2, 1, h2_p)
    w3c, b3_p = cat(w3l, w3r, h2_p, h3_p), _pad2d(b3, 1, h3_p)
    wlin_p = _pad2d(wlin, h3_p, c_p).astype(jnp.bfloat16)
    blin_p = _pad2d(blin, 1, c_p)

    use_fused = (not force_tiled) and (n_pad <= 2048)
    if use_fused:
        out_pad = _fused_forward(a_pad, x_pad, invdeg_pad, p_pad, invcnt_pad,
                                 w1c, b1_p, w2c, b2_p, w3c, b3_p, wlin_p, blin_p)
        return out_pad[:num_graphs, :num_classes]

    h = _sage_layer(a_pad, x_pad, invdeg_pad, w1c, b1_p, tm=tm, tk=tk, apply_relu=True)
    h = _sage_layer(a_pad, h, invdeg_pad, w2c, b2_p, tm=tm, tk=tk, apply_relu=True)
    partials = _sage_layer3_pool(a_pad, h, invdeg_pad, w3c, b3_p, p_pad, tm=tm, tk=tk)

    pooled = partials.sum(axis=0) * invcnt_pad                  # (g_pad, h3_p) f32
    # dropout(p=0.5, training=False) == identity; tiny (G x 64) @ (64 x C) final Linear in f32
    return pooled[:num_graphs, :hid] @ wlin + blin


def _reference_forward(x, a_mean, p_mean, params):
    """Plain-JAX f32 reference with identical semantics (for correctness check)."""
    (w1l, w1r, b1, w2l, w2r, b2, w3l, w3r, b3, wlin, blin) = params

    def layer(h, wl, wr, b):
        return (a_mean @ h) @ wl + h @ wr + b

    h = jax.nn.relu(layer(x, w1l, w1r, b1))
    h = jax.nn.relu(layer(h, w2l, w2r, b2))
    h = layer(h, w3l, w3r, b3)
    g = p_mean @ h
    return g @ wlin + blin


def init_params(key, f_in, num_classes):
    """Deterministic synthetic weights. Linear weights stored as [in, out]."""
    def lin(key, fin, fout, bias):
        kw, kb = jax.random.split(key)
        w = jax.random.normal(kw, (fin, fout), jnp.float32) * (1.0 / jnp.sqrt(fin))
        b = (jax.random.normal(kb, (1, fout), jnp.float32) * 0.01) if bias else None
        return w, b

    keys = jax.random.split(key, 7)
    w1l, b1 = lin(keys[0], f_in, 64, True)     # conv1.lin_l (bias lives here in PyG)
    w1r, _ = lin(keys[1], f_in, 64, False)     # conv1.lin_r (root, no bias)
    w2l, b2 = lin(keys[2], 64, 128, True)      # conv2.lin_l
    w2r, _ = lin(keys[3], 64, 128, False)      # conv2.lin_r
    w3l, b3 = lin(keys[4], 128, 64, True)      # conv3.lin_l
    w3r, _ = lin(keys[5], 128, 64, False)      # conv3.lin_r
    wlin, blin = lin(keys[6], 64, num_classes, True)  # linear1
    return (w1l, w1r, b1, w2l, w2r, b2, w3l, w3r, b3, wlin, blin)


if __name__ == "__main__":
    key = jax.random.PRNGKey(0)
    k_x, k_e, k_p = jax.random.split(key, 3)

    N, F_IN, E, NUM_GRAPHS, NUM_CLASSES = 16, 32, 40, 2, 4

    x = jax.random.normal(k_x, (N, F_IN), jnp.float32)
    edge_index = jax.random.randint(k_e, (2, E), 0, N, jnp.int32)
    # two graphs: first 8 nodes -> graph 0, last 8 -> graph 1
    batch = jnp.concatenate([jnp.zeros(8, jnp.int32), jnp.ones(8, jnp.int32)])

    params = init_params(k_p, F_IN, NUM_CLASSES)

    # Fast (fused single-kernel) path -- the default at this scale.
    out_fused = jax.block_until_ready(
        graphsage_forward(x, edge_index, batch, params, NUM_GRAPHS))
    # Tiled multi-kernel path (what large graphs would take) -- exercised for correctness.
    out_tiled = jax.block_until_ready(
        graphsage_forward(x, edge_index, batch, params, NUM_GRAPHS, force_tiled=True))

    assert out_fused.shape == (NUM_GRAPHS, NUM_CLASSES)
    assert out_tiled.shape == (NUM_GRAPHS, NUM_CLASSES)
    assert jnp.all(jnp.isfinite(out_fused)) and jnp.all(jnp.isfinite(out_tiled))

    # Correctness vs f32 reference (operands bf16, accumulation f32, 1/deg & 1/count in f32).
    counts, inv_deg, onehot, inv_cnt = build_graph_operators(N, edge_index, batch, NUM_GRAPHS)
    ref = _reference_forward(x, counts * inv_deg, onehot * inv_cnt, params)
    assert float(jnp.max(jnp.abs(out_fused - ref))) < 0.25
    assert float(jnp.max(jnp.abs(out_tiled - ref))) < 0.25

    print("KERNEL_OK")
</pallas_src>

<mosaic_0001>
module attributes {stable_mosaic.version = 11 : i64} {
  func.func @_fused_forward_kernel(%arg0: memref<128x128xbf16, #tpu.memory_space<vmem>>, %arg1: memref<128x128xbf16, #tpu.memory_space<vmem>>, %arg2: memref<128x1xf32, #tpu.memory_space<vmem>>, %arg3: memref<8x128xbf16, #tpu.memory_space<vmem>>, %arg4: memref<8x1xf32, #tpu.memory_space<vmem>>, %arg5: memref<256x128xbf16, #tpu.memory_space<vmem>>, %arg6: memref<1x128xf32, #tpu.memory_space<vmem>>, %arg7: memref<256x128xbf16, #tpu.memory_space<vmem>>, %arg8: memref<1x128xf32, #tpu.memory_space<vmem>>, %arg9: memref<256x128xbf16, #tpu.memory_space<vmem>>, %arg10: memref<1x128xf32, #tpu.memory_space<vmem>>, %arg11: memref<128x128xbf16, #tpu.memory_space<vmem>>, %arg12: memref<1x128xf32, #tpu.memory_space<vmem>>, %arg13: memref<8x128xf32, #tpu.memory_space<vmem>>) attributes {dimension_semantics = [], scalar_prefetch = 0 : i64, scratch_operands = 0 : i64, tpu.core_type = #tpu.core_type<tc>} {
    %c0 = arith.constant 0 : index
    %c0_0 = arith.constant 0 : index
    %0 = vector.load %arg0[%c0, %c0_0] : memref<128x128xbf16, #tpu.memory_space<vmem>>, vector<128x128xbf16>
    %c0_1 = arith.constant 0 : index
    %c0_2 = arith.constant 0 : index
    %1 = vector.load %arg2[%c0_1, %c0_2] : memref<128x1xf32, #tpu.memory_space<vmem>>, vector<128x1xf32>
    %c0_3 = arith.constant 0 : index
    %c0_4 = arith.constant 0 : index
    %2 = vector.load %arg1[%c0_3, %c0_4] : memref<128x128xbf16, #tpu.memory_space<vmem>>, vector<128x128xbf16>
    %cst = arith.constant dense<0.000000e+00> : vector<128x128xf32>
    %3 = tpu.matmul %0, %2, %cst {dimension_numbers = #tpu.dot_dimension_numbers<[1], [0], [0], [1], [0, 0, 1, 1], [], []>} : vector<128x128xbf16>, vector<128x128xbf16>, vector<128x128xf32> -> vector<128x128xf32>
    %4 = vector.broadcast %1 : vector<128x1xf32> to vector<128x128xf32>
    %5 = arith.mulf %3, %4 : vector<128x128xf32>
    %6 = arith.truncf %5 : vector<128x128xf32> to vector<128x128xbf16>
    %7 = tpu.concatenate %6, %2 in 1 : vector<128x128xbf16>, vector<128x128xbf16> -> vector<128x256xbf16>
    %c0_5 = arith.constant 0 : index
    %c0_6 = arith.constant 0 : index
    %8 = vector.load %arg5[%c0_5, %c0_6] : memref<256x128xbf16, #tpu.memory_space<vmem>>, vector<256x128xbf16>
    %cst_7 = arith.constant dense<0.000000e+00> : vector<128x128xf32>
    %9 = tpu.matmul %7, %8, %cst_7 {dimension_numbers = #tpu.dot_dimension_numbers<[1], [0], [0], [1], [0, 0, 1, 1], [], []>} : vector<128x256xbf16>, vector<256x128xbf16>, vector<128x128xf32> -> vector<128x128xf32>
    %c0_8 = arith.constant 0 : index
    %c0_9 = arith.constant 0 : index
    %10 = vector.load %arg6[%c0_8, %c0_9] : memref<1x128xf32, #tpu.memory_space<vmem>>, vector<1x128xf32>
    %11 = vector.broadcast %10 : vector<1x128xf32> to vector<128x128xf32>
    %12 = arith.addf %9, %11 : vector<128x128xf32>
    %cst_10 = arith.constant 0.000000e+00 : f32
    %13 = vector.broadcast %cst_10 : f32 to vector<128x128xf32>
    %14 = arith.maximumf %12, %13 : vector<128x128xf32>
    %15 = arith.truncf %14 : vector<128x128xf32> to vector<128x128xbf16>
    %cst_11 = arith.constant dense<0.000000e+00> : vector<128x128xf32>
    %16 = tpu.matmul %0, %15, %cst_11 {dimension_numbers = #tpu.dot_dimension_numbers<[1], [0], [0], [1], [0, 0, 1, 1], [], []>} : vector<128x128xbf16>, vector<128x128xbf16>, vector<128x128xf32> -> vector<128x128xf32>
    %17 = vector.broadcast %1 : vector<128x1xf32> to vector<128x128xf32>
    %18 = arith.mulf %16, %17 : vector<128x128xf32>
    %19 = arith.truncf %18 : vector<128x128xf32> to vector<128x128xbf16>
    %20 = tpu.concatenate %19, %15 in 1 : vector<128x128xbf16>, vector<128x128xbf16> -> vector<128x256xbf16>
    %c0_12 = arith.constant 0 : index
    %c0_13 = arith.constant 0 : index
    %21 = vector.load %arg7[%c0_12, %c0_13] : memref<256x128xbf16, #tpu.memory_space<vmem>>, vector<256x128xbf16>
    %cst_14 = arith.constant dense<0.000000e+00> : vector<128x128xf32>
    %22 = tpu.matmul %20, %21, %cst_14 {dimension_numbers = #tpu.dot_dimension_numbers<[1], [0], [0], [1], [0, 0, 1, 1], [], []>} : vector<128x256xbf16>, vector<256x128xbf16>, vector<128x128xf32> -> vector<128x128xf32>
    %c0_15 = arith.constant 0 : index
    %c0_16 = arith.constant 0 : index
    %23 = vector.load %arg8[%c0_15, %c0_16] : memref<1x128xf32, #tpu.memory_space<vmem>>, vector<1x128xf32>
    %24 = vector.broadcast %23 : vector<1x128xf32> to vector<128x128xf32>
    %25 = arith.addf %22, %24 : vector<128x128xf32>
    %cst_17 = arith.constant 0.000000e+00 : f32
    %26 = vector.broadcast %cst_17 : f32 to vector<128x128xf32>
    %27 = arith.maximumf %25, %26 : vector<128x128xf32>
    %28 = arith.truncf %27 : vector<128x128xf32> to vector<128x128xbf16>
    %cst_18 = arith.constant dense<0.000000e+00> : vector<128x128xf32>
    %29 = tpu.matmul %0, %28, %cst_18 {dimension_numbers = #tpu.dot_dimension_numbers<[1], [0], [0], [1], [0, 0, 1, 1], [], []>} : vector<128x128xbf16>, vector<128x128xbf16>, vector<128x128xf32> -> vector<128x128xf32>
    %30 = vector.broadcast %1 : vector<128x1xf32> to vector<128x128xf32>
    %31 = arith.mulf %29, %30 : vector<128x128xf32>
    %32 = arith.truncf %31 : vector<128x128xf32> to vector<128x128xbf16>
    %33 = tpu.concatenate %32, %28 in 1 : vector<128x128xbf16>, vector<128x128xbf16> -> vector<128x256xbf16>
    %c0_19 = arith.constant 0 : index
    %c0_20 = arith.constant 0 : index
    %34 = vector.load %arg9[%c0_19, %c0_20] : memref<256x128xbf16, #tpu.memory_space<vmem>>, vector<256x128xbf16>
    %cst_21 = arith.constant dense<0.000000e+00> : vector<128x128xf32>
    %35 = tpu.matmul %33, %34, %cst_21 {dimension_numbers = #tpu.dot_dimension_numbers<[1], [0], [0], [1], [0, 0, 1, 1], [], []>} : vector<128x256xbf16>, vector<256x128xbf16>, vector<128x128xf32> -> vector<128x128xf32>
    %c0_22 = arith.constant 0 : index
    %c0_23 = arith.constant 0 : index
    %36 = vector.load %arg10[%c0_22, %c0_23] : memref<1x128xf32, #tpu.memory_space<vmem>>, vector<1x128xf32>
    %37 = vector.broadcast %36 : vector<1x128xf32> to vector<128x128xf32>
    %38 = arith.addf %35, %37 : vector<128x128xf32>
    %c0_24 = arith.constant 0 : index
    %c0_25 = arith.constant 0 : index
    %39 = vector.load %arg3[%c0_24, %c0_25] : memref<8x128xbf16, #tpu.memory_space<vmem>>, vector<8x128xbf16>
    %40 = arith.truncf %38 : vector<128x128xf32> to vector<128x128xbf16>
    %cst_26 = arith.constant dense<0.000000e+00> : vector<8x128xf32>
    %41 = tpu.matmul %39, %40, %cst_26 {dimension_numbers = #tpu.dot_dimension_numbers<[1], [0], [0], [1], [0, 0, 1, 1], [], []>} : vector<8x128xbf16>, vector<128x128xbf16>, vector<8x128xf32> -> vector<8x128xf32>
    %c0_27 = arith.constant 0 : index
    %c0_28 = arith.constant 0 : index
    %42 = vector.load %arg4[%c0_27, %c0_28] : memref<8x1xf32, #tpu.memory_space<vmem>>, vector<8x1xf32>
    %43 = vector.broadcast %42 : vector<8x1xf32> to vector<8x128xf32>
    %44 = arith.mulf %41, %43 : vector<8x128xf32>
    %45 = arith.truncf %44 : vector<8x128xf32> to vector<8x128xbf16>
    %c0_29 = arith.constant 0 : index
    %c0_30 = arith.constant 0 : index
    %46 = vector.load %arg11[%c0_29, %c0_30] : memref<128x128xbf16, #tpu.memory_space<vmem>>, vector<128x128xbf16>
    %cst_31 = arith.constant dense<0.000000e+00> : vector<8x128xf32>
    %47 = tpu.matmul %45, %46, %cst_31 {dimension_numbers = #tpu.dot_dimension_numbers<[1], [0], [0], [1], [0, 0, 1, 1], [], []>} : vector<8x128xbf16>, vector<128x128xbf16>, vector<8x128xf32> -> vector<8x128xf32>
    %c0_32 = arith.constant 0 : index
    %c0_33 = arith.constant 0 : index
    %48 = vector.load %arg12[%c0_32, %c0_33] : memref<1x128xf32, #tpu.memory_space<vmem>>, vector<1x128xf32>
    %49 = vector.broadcast %48 : vector<1x128xf32> to vector<8x128xf32>
    %50 = arith.addf %47, %49 : vector<8x128xf32>
    %c0_34 = arith.constant 0 : index
    %c0_35 = arith.constant 0 : index
    %51 = vector.load %arg13[%c0_34, %c0_35] : memref<8x128xf32, #tpu.memory_space<vmem>>, vector<8x128xf32>
    tpu.vector_store %arg13[%c0_34, %c0_35], %50 {strides = array<i32>} : memref<8x128xf32, #tpu.memory_space<vmem>>, vector<8x128xf32>,
    return
  }
}

</mosaic_0001>

<bundles_post_ra>
// kernel: tpu_custom_call.1
= control target key start
LH: loop header
LB: loop body
LE: loop exit
PB: predicated region body
PF: predicated region fallthrough
CT: control target
= control target key end

     0   :  { %18 = vsyncpa [#allocation3], 0  ;;  %s2931_s0 = inlined_call_operand.hbm [shape: bf16[128,128], index: 0, kind: input, shape index: {}]   ;;  %s2932_s1 = inlined_call_operand.hbm [shape: bf16[128,128], index: 1, kind: input, shape index: {}]   ;;  %s2933_s2 = inlined_call_operand.vmem [shape: f32[128,1], index: 2, kind: input, shape index: {}]   ;;  %s2934_s3 = inlined_call_operand.vmem [shape: bf16[8,128], index: 3, kind: input, shape index: {}]   ;;  %s2935_s4 = inlined_call_operand.vmem [shape: f32[8,1], index: 4, kind: input, shape index: {}]   ;;  %s2936_s5 = inlined_call_operand.vmem [shape: bf16[256,128], index: 5, kind: input, shape index: {}]   ;;  %s2937_s6 = inlined_call_operand.vmem [shape: f32[1,128], index: 6, kind: input, shape index: {}]   ;;  %s2938_s7 = inlined_call_operand.hbm [shape: bf16[256,128], index: 7, kind: input, shape index: {}]   ;;  %s2939_s8 = inlined_call_operand.vmem [shape: f32[1,128], index: 8, kind: input, shape index: {}]   ;;  %s2940_s9 = inlined_call_operand.hbm [shape: bf16[256,128], index: 9, kind: input, shape index: {}]   ;;  %s2941_s10 = inlined_call_operand.vmem [shape: f32[1,128], index: 10, kind: input, shape index: {}]   ;;  %s2942_s11 = inlined_call_operand.hbm [shape: bf16[128,128], index: 11, kind: input, shape index: {}]   ;;  %s2943_s12 = inlined_call_operand.vmem [shape: f32[1,128], index: 12, kind: input, shape index: {}]   ;;  %s2944_s13 = inlined_call_operand.hbm [shape: f32[8,128], index: 13, kind: output, shape index: {}]  }
   0x1   :  { %19 = vsyncpa [#allocation6], 0 }
   0x2   :  { %20 = vsyncpa [#allocation9], 0 }
   0x3   :  { %21 = vsyncpa [#allocation4], 0  ;;  %s2328_s25 = smov [#allocation5]   ;;  %s2329_s27 = smov [#allocation8]  }
   0x4   :  { %s39_s26 = sshll.u32 %s2328_s25, 4  ;;  %s75_s28 = sshll.u32 %s2329_s27, 4  ;;  %s40_s26 = int_to_ptr.vmem [resolvable:$true] %s39_s26  ;;  %s2409_s28 = int_to_ptr.vmem [resolvable:$true] %s75_s28 }
   0x5   :  { %s2188_s14 = scalar_lea.hbm %s2932_s1, 1024 }
   0x6   :  { %p2189_p0 = scmp.ne.s32.totalorder %s2932_s1, %s2188_s14  ;;  %p2192_p1 = scmp.lt.u32.totalorder %s2188_s14, %s2932_s1 }
   0x8   :  { %p2194_p2 = pnand %p2192_p1, %p2189_p0 }
   0xa   :  { %2197 = shalt.err (!%p2194_p2)
}
   0xb   :  { %s2198_s19 = scalar_lea.vmem %s40_s26, 1024  ;;  %p2203_p4 = scmp.lt.s32.totalorder %s40_s26, %s40_s26 }
   0xc   :  { %p2199_p3 = scmp.ne.s32.totalorder %s40_s26, %s2198_s19  ;;  %p2204_p5 = scmp.lt.s32.totalorder %s2198_s19, %s2198_s19 }
   0xe   :  { %p2205_p6 = por %p2204_p5, %p2203_p4 }
  0x10   :  { %p2206_p7 = pnand %p2205_p6, %p2199_p3 }
  0x12   :  { %2209 = shalt.err (!%p2206_p7)
}
  0x13   :  { %s2330_s20 = smov 64   ;;  %s2331_s21 = smov 4  }
  0x14   :  { %45 = dma.hbm_to_vmem [thread:$0]  %s2932_s1, 1024, %s40_s26, [#allocation6], %s2330_s20, %s2330_s20, %s2331_s21  }
  0x15   :  { %s2210_s27 = scalar_lea.hbm %s2940_s9, 2048 }
  0x16   :  { %p2211_p8 = scmp.ne.s32.totalorder %s2940_s9, %s2210_s27  ;;  %p2214_p9 = scmp.lt.u32.totalorder %s2210_s27, %s2940_s9 }
  0x18   :  { %p2216_p10 = pnand %p2214_p9, %p2211_p8 }
  0x1a   :  { %2219 = shalt.err (!%p2216_p10)
}
  0x1b   :  { %s2220_s16 = scalar_lea.vmem %s2409_s28, 2048  ;;  %p2225_p12 = scmp.lt.s32.totalorder %s2409_s28, %s2409_s28 }
  0x1c   :  { %p2221_p11 = scmp.ne.s32.totalorder %s2409_s28, %s2220_s16  ;;  %p2226_p13 = scmp.lt.s32.totalorder %s2220_s16, %s2220_s16 }
  0x1e   :  { %p2227_p0 = por %p2226_p13, %p2225_p12 }
  0x20   :  { %p2228_p1 = pnand %p2227_p0, %p2221_p11 }
  0x22   :  { %2231 = shalt.err (!%p2228_p1)
}
  0x23   :  { %81 = dma.hbm_to_vmem [thread:$0]  %s2940_s9, 2048, %s2409_s28, [#allocation9], %s2330_s20, %s2330_s20, %s2331_s21  }
  0x24   :  { %s2332_s17 = smov [#allocation2]   ;;  %s2333_s19 = smov [#allocation7]  }
  0x25   :  { %s27_s18 = sshll.u32 %s2332_s17, 4  ;;  %s61_s22 = sshll.u32 %s2333_s19, 4  ;;  %s28_s18 = int_to_ptr.vmem [resolvable:$true] %s27_s18  ;;  %s2446_s22 = int_to_ptr.vmem [resolvable:$true] %s61_s22 }
  0x26   :  { %s2232_s25 = scalar_lea.hbm %s2931_s0, 1024 }
  0x27   :  { %p2233_p2 = scmp.ne.s32.totalorder %s2931_s0, %s2232_s25  ;;  %p2236_p3 = scmp.lt.u32.totalorder %s2232_s25, %s2931_s0 }
  0x29   :  { %p2238_p4 = pnand %p2236_p3, %p2233_p2 }
  0x2b   :  { %2241 = shalt.err (!%p2238_p4)
}
  0x2c   :  { %s2242_s9 = scalar_lea.vmem %s28_s18, 1024  ;;  %p2247_p6 = scmp.lt.s32.totalorder %s28_s18, %s28_s18 }
  0x2d   :  { %p2243_p5 = scmp.ne.s32.totalorder %s28_s18, %s2242_s9  ;;  %p2248_p7 = scmp.lt.s32.totalorder %s2242_s9, %s2242_s9 }
  0x2f   :  { %p2249_p8 = por %p2248_p7, %p2247_p6 }
  0x31   :  { %p2250_p9 = pnand %p2249_p8, %p2243_p5 }
  0x33   :  { %2253 = shalt.err (!%p2250_p9)
}
  0x34   :  { %33 = dma.hbm_to_vmem [thread:$0]  %s2931_s0, 1024, %s28_s18, [#allocation3], %s2330_s20, %s2330_s20, %s2331_s21  }
  0x35   :  { %s2254_s26 = scalar_lea.hbm %s2938_s7, 2048 }
  0x36   :  { %p2255_p10 = scmp.ne.s32.totalorder %s2938_s7, %s2254_s26  ;;  %p2258_p11 = scmp.lt.u32.totalorder %s2254_s26, %s2938_s7 }
  0x38   :  { %p2260_p12 = pnand %p2258_p11, %p2255_p10 }
  0x3a   :  { %2263 = shalt.err (!%p2260_p12)
}
  0x3b   :  { %s2264_s25 = scalar_lea.vmem %s2446_s22, 2048  ;;  %p2269_p0 = scmp.lt.s32.totalorder %s2446_s22, %s2446_s22 }
  0x3c   :  { %p2265_p13 = scmp.ne.s32.totalorder %s2446_s22, %s2264_s25  ;;  %p2270_p1 = scmp.lt.s32.totalorder %s2264_s25, %s2264_s25 }
  0x3e   :  { %p2271_p2 = por %p2270_p1, %p2269_p0 }
  0x40   :  { %p2272_p3 = pnand %p2271_p2, %p2265_p13 }
  0x42   :  { %2275 = shalt.err (!%p2272_p3)
}
  0x43   :  { %67 = dma.hbm_to_vmem [thread:$0]  %s2938_s7, 2048, %s2446_s22, [#allocation6], %s2330_s20, %s2330_s20, %s2331_s21  }
  0x44   :  { %s2334_s27 = smov [#allocation10]   ;;  %s2276_s9 = scalar_lea.hbm %s2942_s11, 1024 }
  0x45   :  { %s89_s29 = sshll.u32 %s2334_s27, 4  ;;  %p2277_p4 = scmp.ne.s32.totalorder %s2942_s11, %s2276_s9  ;;  %s90_s29 = int_to_ptr.vmem [resolvable:$true] %s89_s29 }
  0x46   :  { %p2280_p5 = scmp.lt.u32.totalorder %s2276_s9, %s2942_s11 }
  0x48   :  { %p2282_p6 = pnand %p2280_p5, %p2277_p4 }
  0x4a   :  { %2285 = shalt.err (!%p2282_p6)
}
  0x4b   :  { %s2286_s26 = scalar_lea.vmem %s90_s29, 1024  ;;  %p2291_p8 = scmp.lt.s32.totalorder %s90_s29, %s90_s29 }
  0x4c   :  { %p2287_p7 = scmp.ne.s32.totalorder %s90_s29, %s2286_s26  ;;  %p2292_p9 = scmp.lt.s32.totalorder %s2286_s26, %s2286_s26 }
  0x4e   :  { %p2293_p10 = por %p2292_p9, %p2291_p8 }
  0x50   :  { %p2294_p11 = pnand %p2293_p10, %p2287_p7 }
  0x52   :  { %2297 = shalt.err (!%p2294_p11)
}
  0x53   :  { %95 = dma.hbm_to_vmem [thread:$0]  %s2942_s11, 1024, %s90_s29, [#allocation9], %s2330_s20, %s2330_s20, %s2331_s21  }
  0x54   :  { %2320 = dma.done.wait [#allocation3], 1024  }
  0x55   :  { %2321 = vsyncadd [#allocation3], 4294966272 }
  0x56   :  { %2322 = dma.done.wait [#allocation6], 3072  }
  0x57   :  { %2323 = vsyncadd [#allocation6], 4294964224 }
  0x58   :  { %2324 = dma.done.wait [#allocation9], 3072  }
  0x59   :  { %2325 = vsyncadd [#allocation9], 4294964224  ;;  %v2335_v0 = vmov 0   ;;  %v2114_v1 = vld [vmem:[#allocation5] sm:$0xff]   ;;  %v2498_v2 = vld [vmem:[#allocation5 + $0x8] sm:$0xff]   ;;  %vm2337_vm0 = vmmov 0  }
  0x5a   :  { %2112 = vset.pattern.permute.xlu0 %v2335_v0  ;;  %2113 = vset.pattern.permute.xlu1 %v2335_v0  ;;  %v2501_v3 = vld [vmem:[#allocation5 + $0x10] sm:$0xff]   ;;  %v2504_v4 = vld [vmem:[#allocation5 + $0x18] sm:$0xff]   ;;  %v2507_v5 = vld [vmem:[#allocation2] sm:$0xff]   ;;  %s2338_s17 = smov [#allocation11]  }
  0x5b   :  { %1965 = vmatprep.subr.bf16.mxu0 %v2114_v1  ;;  %626 = vmatprep.mubr.bf16.mxu1 %v2114_v1  ;;  %v2512_v6 = vld [vmem:[#allocation5 + $0x20] sm:$0xff]   ;;  %v2516_v7 = vld [vmem:[#allocation5 + $0x28] sm:$0xff]   ;;  %v132_v9 = vld [vmem:[%s2933_s2 + $0x10] sm:$0xff]  ;;  %s1620_s19 = sshll.u32 %s2338_s17, 4  ;;  %s1621_s19 = int_to_ptr.vmem [resolvable:$true] %s1620_s19 }
  0x5c   :  { %1966 = vmatpush3.bf16.msra.mxu0 %v2114_v1  ;;  %1981 = vmatprep.mubr.bf16.mxu0 %v2507_v5  ;;  %v130_v8 = vld [vmem:[%s2933_s2] sm:$0xff]  ;;  %v131_v10 = vld [vmem:[%s2933_s2 + $0x8] sm:$0xff]  ;;  %v133_v11 = vld [vmem:[%s2933_s2 + $0x18] sm:$0xff]  ;;  %s2298_s23 = scalar_lea.vmem %s1621_s19, 128  ;;  %p2303_p13 = scmp.lt.s32.totalorder %s1621_s19, %s1621_s19 }
  0x5d   :  { %1967 = vmatprep.subr.bf16.mxu0 %v2498_v2  ;;  %357 = vperm.xlu0 %2112, %v130_v8   ;;  %v2532_v12 = vld [vmem:[#allocation5 + $0x30] sm:$0xff]   ;;  %v134_v13 = vld [vmem:[%s2933_s2 + $0x20] sm:$0xff]  ;;  %v135_v14 = vld [vmem:[%s2933_s2 + $0x28] sm:$0xff]  ;;  %p2299_p12 = scmp.ne.s32.totalorder %s1621_s19, %s2298_s23  ;;  %p2304_p0 = scmp.lt.s32.totalorder %s2298_s23, %s2298_s23 }
  0x5e   :  { %367 = vperm.xlu1 %2113, %v132_v9   ;;  %v2540_v15 = vld [vmem:[#allocation5 + $0x38] sm:$0xff]   ;;  %v136_v16 = vld [vmem:[%s2933_s2 + $0x30] sm:$0xff]  ;;  %v2130_v17 = vld [vmem:[%s2936_s5 + $0x40] sm:$0xff]  }
  0x5f   :  { %v2131_v18 = vld [vmem:[%s2936_s5] sm:$0xff]   ;;  %v137_v19 = vld [vmem:[%s2933_s2 + $0x38] sm:$0xff]  ;;  %1723 = vmatprep.subr.bf16.mxu1 %v2130_v17  ;;  %v2558_v20 = vld [vmem:[#allocation2 + $0x8] sm:$0xff]   ;;  %p2305_p1 = por %p2304_p0, %p2303_p13 }
  0x60   :  { %1968 = vmatpush3.bf16.msra.mxu0 %v2498_v2  ;;  %1724 = vmatpush3.bf16.msra.mxu1 %v2131_v18  ;;  %v138_v21 = vld [vmem:[%s2933_s2 + $0x40] sm:$0xff]  ;;  %v2132_v22 = vld [vmem:[%s2936_s5 + $0x48] sm:$0xff]   ;;  %v2569_v24 = vld [vmem:[#allocation2 + $0x10] sm:$0xff]  }
  0x61   :  { %1969 = vmatprep.subr.bf16.mxu0 %v2501_v3  ;;  %362 = vperm.xlu0 %2112, %v131_v10   ;;  %v2133_v23 = vld [vmem:[%s2936_s5 + $0x8] sm:$0xff]   ;;  %v140_v26 = vld [vmem:[%s2933_s2 + $0x50] sm:$0xff]  ;;  %v141_v29 = vld [vmem:[%s2933_s2 + $0x58] sm:$0xff]  ;;  %p2306_p2 = pnand %p2305_p1, %p2299_p12 }
  0x62   :  { %372 = vperm.xlu1 %2113, %v133_v11   ;;  %v139_v25 = vld [vmem:[%s2933_s2 + $0x48] sm:$0xff]  ;;  %1725 = vmatprep.subr.bf16.mxu1 %v2132_v22  ;;  %v2134_v27 = vld [vmem:[%s2936_s5 + $0x50] sm:$0xff]   ;;  %v2589_v30 = vld [vmem:[#allocation2 + $0x18] sm:$0xff]  }
  0x63   :  { %v2135_v28 = vld [vmem:[%s2936_s5 + $0x10] sm:$0xff]   ;;  %v142_v31 = vld [vmem:[%s2933_s2 + $0x60] sm:$0xff]  ;;  %v2136_v32 = vld [vmem:[%s2936_s5 + $0x58] sm:$0xff]  }
  0x64   :  { %1970 = vmatpush3.bf16.msra.mxu0 %v2501_v3  ;;  %1726 = vmatpush3.bf16.msra.mxu1 %v2133_v23  ;;  %v2137_v33 = vld [vmem:[%s2936_s5 + $0x18] sm:$0xff]   ;;  %v2600_v34 = vld [vmem:[#allocation2 + $0x20] sm:$0xff]   ;;  %v143_v35 = vld [vmem:[%s2933_s2 + $0x68] sm:$0xff] }
  0x65   :  { %1971 = vmatprep.subr.bf16.mxu0 %v2504_v4  ;;  %377 = vperm.xlu0 %2112, %v134_v13   ;;  %v144_v36 = vld [vmem:[%s2933_s2 + $0x70] sm:$0xff]  ;;  %v2138_v37 = vld [vmem:[%s2936_s5 + $0x60] sm:$0xff]   ;;  %v145_v39 = vld [vmem:[%s2933_s2 + $0x78] sm:$0xff] }
  0x66   :  { %382 = vperm.xlu1 %2113, %v135_v14   ;;  %1727 = vmatprep.subr.bf16.mxu1 %v2134_v27  ;;  %v2139_v38 = vld [vmem:[%s2936_s5 + $0x20] sm:$0xff]   ;;  %v2619_v40 = vld [vmem:[#allocation2 + $0x28] sm:$0xff]   ;;  %v2630_v44 = vld [vmem:[#allocation2 + $0x30] sm:$0xff]  }
  0x67   :  { %v1494_v41 = vld [vmem:[%s2935_s4] sm:$0xff]  ;;  %v2140_v42 = vld [vmem:[%s2936_s5 + $0x68] sm:$0xff]   ;;  %v2634_v45 = vld [vmem:[#allocation2 + $0x38] sm:$0xff]  }
  0x68   :  { %1972 = vmatpush3.bf16.msra.mxu0 %v2504_v4  ;;  %1728 = vmatpush3.bf16.msra.mxu1 %v2135_v28  ;;  %v2141_v43 = vld [vmem:[%s2936_s5 + $0x28] sm:$0xff]   ;;  %v2142_v46 = vld [vmem:[%s2936_s5 + $0x70] sm:$0xff]   ;;  %v2144_v48 = vld [vmem:[%s2936_s5 + $0x78] sm:$0xff]  }
  0x69   :  { %1973 = vmatprep.subr.bf16.mxu0 %v2512_v6  ;;  %387 = vperm.xlu0 %2112, %v136_v16   ;;  %v2143_v47 = vld [vmem:[%s2936_s5 + $0x30] sm:$0xff]   ;;  %v2145_v49 = vld [vmem:[%s2936_s5 + $0x38] sm:$0xff]  }
  0x6a   :  { %392 = vperm.xlu1 %2113, %v137_v19   ;;  %1729 = vmatprep.subr.bf16.mxu1 %v2136_v32 }
  0x6c   :  { %1974 = vmatpush3.bf16.msra.mxu0 %v2512_v6  ;;  %1730 = vmatpush3.bf16.msra.mxu1 %v2137_v33 }
  0x6d   :  { %1975 = vmatprep.subr.bf16.mxu0 %v2516_v7  ;;  %397 = vperm.xlu0 %2112, %v138_v21  }
  0x6e   :  { %402 = vperm.xlu1 %2113, %v139_v25   ;;  %1731 = vmatprep.subr.bf16.mxu1 %v2138_v37 }
  0x70   :  { %1976 = vmatpush3.bf16.msra.mxu0 %v2516_v7  ;;  %1732 = vmatpush3.bf16.msra.mxu1 %v2139_v38 }
  0x71   :  { %1977 = vmatprep.subr.bf16.mxu0 %v2532_v12  ;;  %407 = vperm.xlu0 %2112, %v140_v26  }
  0x72   :  { %412 = vperm.xlu1 %2113, %v141_v29   ;;  %1733 = vmatprep.subr.bf16.mxu1 %v2140_v42 }
  0x74   :  { %1978 = vmatpush3.bf16.msra.mxu0 %v2532_v12  ;;  %1734 = vmatpush3.bf16.msra.mxu1 %v2141_v43 }
  0x75   :  { %1979 = vmatprep.subr.bf16.mxu0 %v2540_v15  ;;  %417 = vperm.xlu0 %2112, %v142_v31  }
  0x76   :  { %422 = vperm.xlu1 %2113, %v143_v35   ;;  %1735 = vmatprep.subr.bf16.mxu1 %v2142_v46 }
  0x78   :  { %1980 = vmatpush3.bf16.msra.mxu0 %v2540_v15  ;;  %1736 = vmatpush3.bf16.msra.mxu1 %v2143_v47 }
  0x79   :  { %427 = vperm.xlu0 %2112, %v144_v36   ;;  %1737 = vmatprep.subr.bf16.mxu1 %v2144_v48 }
  0x7a   :  { %432 = vperm.xlu1 %2113, %v145_v39  }
  0x7b   :  { %1982 = vmatmul.mubr.bf16.vlgmr.msra.gmra.mrb[0].mxu0 %v2558_v20 }
  0x7c   :  { %1985 = vmatprep.mubr.bf16.mxu0 %v2569_v24  ;;  %1738 = vmatpush3.bf16.msra.mxu1 %v2145_v49 }
  0x7d   :  { %1497 = vperm.xlu0 %2112, %v1494_v41  }
  0x83   :  { %1986 = vmatmul.mubr.bf16.gmra.mrb[4].mxu0 %v2589_v30 }
  0x84   :  { %1989 = vmatprep.mubr.bf16.mxu0 %v2600_v34 }
  0x8b   :  { %1990 = vmatmul.mubr.bf16.gmra.mrb[8].mxu0 %v2619_v40 }
  0x8c   :  { %1993 = vmatprep.mubr.bf16.mxu0 %v2630_v44 }
  0x93   :  { %1994 = vmatmul.mubr.bf16.gmra.mrb[12].mxu0 %v2634_v45 }
  0x94   :  { %2013 = vmatprep.mubr.bf16.mxu0 %v2507_v5 }
  0xdc   :  { %v2650_v50 = vpop.permute.xlu0 %357 }
  0xdd   :  { %v2652_v51 = vpop.permute.xlu1 %367 }
  0xe0   :  { %v2654_v52 = vpop.permute.xlu0 %362 }
  0xe1   :  { %v2656_v53 = vpop.permute.xlu1 %372 }
  0xe4   :  { %v2658_v54 = vpop.permute.xlu0 %377 }
  0xe5   :  { %v2660_v55 = vpop.permute.xlu1 %382 }
  0xe8   :  { %v2662_v57 = vpop.permute.xlu0 %387 }
  0xe9   :  { %v2664_v59 = vpop.permute.xlu1 %392 }
  0xec   :  { %v2670_v10 = vpop.permute.xlu0 %397 }
  0xed   :  { %v2672_v11 = vpop.permute.xlu1 %402 }
  0xf0   :  { %v2679_v23 = vpop.permute.xlu0 %407 }
  0xf1   :  { %v2681_v26 = vpop.permute.xlu1 %412 }
  0xf4   :  { %v2684_v31 = vpop.permute.xlu0 %417 }
  0xf5   :  { %v2688_v36 = vpop.permute.xlu1 %422 }
  0xf8   :  { %v2692_v43 = vpop.permute.xlu0 %427 }
  0xf9   :  { %v2695_v46 = vpop.permute.xlu1 %432 }
 0x14e   :  { %v1983_v56 = vpop.f32.mrb[0].mxu0 }
 0x14f   :  { %v292_v58 = vpop.f32.mrb[1].mxu0  ;;  %v437_v61 = vmul.f32 %v1983_v56, %v2652_v51 }
 0x150   :  { %v1984_v60 = vpop.f32.mrb[2].mxu0  ;;  %v435_v0 = vmul.f32 %v2650_v50, %v292_v58 }
 0x151   :  { %v438_v62 = vmul.f32 %v1984_v60, %v2656_v53  ;;  %v295_v63 = vpop.f32.mrb[3].mxu0 }
 0x152   :  { %v436_v1 = vmul.f32 %v2654_v52, %v295_v63  ;;  %v2709_v63 = vld [vmem:[%s2937_s6] ss:$0 sm:$0xff] }
 0x153   :  { %v452_v8 = vpack.c.bf16 %v438_v62, %v437_v61 }
 0x154   :  { %v451_v9 = vpack.c.bf16 %v436_v1, %v435_v0 }
 0x156   :  { %v1987_v13 = vpop.f32.mrb[4].mxu0  ;;  %627 = vmatmul.mubr.bf16.vlgmr.msra.gmra.mrb[0].mxu1 %v451_v9 }
 0x157   :  { %v308_v14 = vpop.f32.mrb[5].mxu0  ;;  %634 = vmatprep.mubr.bf16.mxu1 %v2498_v2  ;;  %v441_v17 = vmul.f32 %v1987_v13, %v2662_v57 }
 0x158   :  { %v1988_v16 = vpop.f32.mrb[6].mxu0  ;;  %v439_v21 = vmul.f32 %v2658_v54, %v308_v14 }
 0x159   :  { %v442_v18 = vmul.f32 %v1988_v16, %v2664_v59  ;;  %v311_v19 = vpop.f32.mrb[7].mxu0 }
 0x15a   :  { %v440_v22 = vmul.f32 %v2660_v55, %v311_v19 }
 0x15b   :  { %v454_v25 = vpack.c.bf16 %v442_v18, %v441_v17 }
 0x15c   :  { %v453_v27 = vpack.c.bf16 %v440_v22, %v439_v21 }
 0x15e   :  { %v1991_v28 = vpop.f32.mrb[8].mxu0  ;;  %635 = vmatmul.mubr.bf16.gmra.mrb[4].mxu1 %v452_v8 }
 0x15f   :  { %v324_v29 = vpop.f32.mrb[9].mxu0  ;;  %642 = vmatprep.mubr.bf16.mxu1 %v2501_v3  ;;  %v445_v32 = vmul.f32 %v1991_v28, %v2679_v23 }
 0x160   :  { %v1992_v2 = vpop.f32.mrb[10].mxu0  ;;  %v443_v37 = vmul.f32 %v2670_v10, %v324_v29 }
 0x161   :  { %v446_v33 = vmul.f32 %v1992_v2, %v2681_v26  ;;  %v327_v35 = vpop.f32.mrb[11].mxu0 }
 0x162   :  { %v444_v38 = vmul.f32 %v2672_v11, %v327_v35 }
 0x163   :  { %v456_v39 = vpack.c.bf16 %v446_v33, %v445_v32 }
 0x164   :  { %v455_v41 = vpack.c.bf16 %v444_v38, %v443_v37 }
 0x166   :  { %v1995_v42 = vpop.f32.mrb[12].mxu0  ;;  %643 = vmatmul.mubr.bf16.gmra.mrb[8].mxu1 %v453_v27 }
 0x167   :  { %v340_v3 = vpop.f32.mrb[13].mxu0  ;;  %650 = vmatprep.mubr.bf16.mxu1 %v2504_v4  ;;  %v449_v48 = vmul.f32 %v1995_v42, %v2692_v43 }
 0x168   :  { %v1996_v47 = vpop.f32.mrb[14].mxu0  ;;  %v447_v58 = vmul.f32 %v2684_v31, %v340_v3 }
 0x169   :  { %v450_v49 = vmul.f32 %v1996_v47, %v2695_v46  ;;  %v343_v56 = vpop.f32.mrb[15].mxu0 }
 0x16a   :  { %v448_v60 = vmul.f32 %v2688_v36, %v343_v56 }
 0x16b   :  { %v458_v61 = vpack.c.bf16 %v450_v49, %v449_v48 }
 0x16c   :  { %v457_v62 = vpack.c.bf16 %v448_v60, %v447_v58 }
 0x16e   :  { %651 = vmatmul.mubr.bf16.gmra.mrb[12].mxu1 %v454_v25 }
 0x16f   :  { %658 = vmatprep.mubr.bf16.mxu1 %v2512_v6 }
 0x176   :  { %659 = vmatmul.mubr.bf16.gmra.mrb[16].mxu1 %v455_v41 }
 0x177   :  { %666 = vmatprep.mubr.bf16.mxu1 %v2516_v7 }
 0x17e   :  { %667 = vmatmul.mubr.bf16.gmra.mrb[20].mxu1 %v456_v39 }
 0x17f   :  { %674 = vmatprep.mubr.bf16.mxu1 %v2532_v12 }
 0x186   :  { %675 = vmatmul.mubr.bf16.gmra.mrb[24].mxu1 %v457_v62 }
 0x187   :  { %682 = vmatprep.mubr.bf16.mxu1 %v2540_v15 }
 0x18e   :  { %683 = vmatmul.mubr.bf16.gmra.mrb[28].mxu1 %v458_v61 }
 0x18f   :  { %2045 = vmatprep.mubr.bf16.mxu1 %v2507_v5 }
 0x229   :  { %v1739_v4 = vpop.f32.mrb[0].mxu1 }
 0x22a   :  { %v1740_v0 = vpop.f32.mrb[1].mxu1 }
 0x22b   :  { %v1741_v6 = vadd.f32 %v1740_v0, %v1739_v4  ;;  %v1742_v1 = vpop.f32.mrb[2].mxu1 }
 0x22c   :  { %v1743_v8 = vpop.f32.mrb[3].mxu1 }
 0x22d   :  { %v629_v7 = vadd.f32 %v1741_v6, %v2709_v63  ;;  %v1744_v9 = vadd.f32 %v1743_v8, %v1742_v1 }
 0x22f   :  { %v632_v12 = vadd.f32 %v1744_v9, %v2709_v63  ;;  %v691_v13 = vmax.f32 %v629_v7, 0.0 }
 0x231   :  { %v692_v15 = vmax.f32 %v632_v12, 0.0  ;;  %v1745_v14 = vpop.f32.mrb[4].mxu1 }
 0x232   :  { %v1746_v16 = vpop.f32.mrb[5].mxu1 }
 0x233   :  { %v1747_v5 = vadd.f32 %v1746_v16, %v1745_v14  ;;  %v1748_v17 = vpop.f32.mrb[6].mxu1  ;;  %v2713_v18 = vpack.c.bf16 %v692_v15, %v691_v13 }
 0x234   :  { %v1749_v19 = vpop.f32.mrb[7].mxu1 }
 0x235   :  { %v637_v21 = vadd.f32 %v1747_v5, %v2709_v63  ;;  %v1750_v22 = vadd.f32 %v1749_v19, %v1748_v17  ;;  %1997 = vmatprep.subr.bf16.mxu0 %v2713_v18 }
 0x236   :  { %1998 = vmatpush3.bf16.msra.mxu0 %v2713_v18 }
 0x237   :  { %v640_v25 = vadd.f32 %v1750_v22, %v2709_v63  ;;  %v693_v27 = vmax.f32 %v637_v21, 0.0 }
 0x239   :  { %v694_v28 = vmax.f32 %v640_v25, 0.0  ;;  %v1751_v29 = vpop.f32.mrb[8].mxu1 }
 0x23a   :  { %v1752_v2 = vpop.f32.mrb[9].mxu1 }
 0x23b   :  { %v1753_v32 = vadd.f32 %v1752_v2, %v1751_v29  ;;  %v1754_v33 = vpop.f32.mrb[10].mxu1  ;;  %v2719_v35 = vpack.c.bf16 %v694_v28, %v693_v27 }
 0x23c   :  { %v1755_v37 = vpop.f32.mrb[11].mxu1 }
 0x23d   :  { %v645_v38 = vadd.f32 %v1753_v32, %v2709_v63  ;;  %v1756_v39 = vadd.f32 %v1755_v37, %v1754_v33  ;;  %1999 = vmatprep.subr.bf16.mxu0 %v2719_v35 }
 0x23e   :  { %2000 = vmatpush3.bf16.msra.mxu0 %v2719_v35 }
 0x23f   :  { %v648_v41 = vadd.f32 %v1756_v39, %v2709_v63  ;;  %v695_v42 = vmax.f32 %v645_v38, 0.0 }
 0x241   :  { %v696_v3 = vmax.f32 %v648_v41, 0.0  ;;  %v1757_v47 = vpop.f32.mrb[12].mxu1 }
 0x242   :  { %v1758_v48 = vpop.f32.mrb[13].mxu1 }
 0x243   :  { %v1759_v49 = vadd.f32 %v1758_v48, %v1757_v47  ;;  %v1760_v56 = vpop.f32.mrb[14].mxu1  ;;  %v2725_v58 = vpack.c.bf16 %v696_v3, %v695_v42 }
 0x244   :  { %v1761_v60 = vpop.f32.mrb[15].mxu1 }
 0x245   :  { %v653_v61 = vadd.f32 %v1759_v49, %v2709_v63  ;;  %v1762_v62 = vadd.f32 %v1761_v60, %v1760_v56  ;;  %2001 = vmatprep.subr.bf16.mxu0 %v2725_v58 }
 0x246   :  { %2002 = vmatpush3.bf16.msra.mxu0 %v2725_v58 }
 0x247   :  { %v656_v4 = vadd.f32 %v1762_v62, %v2709_v63  ;;  %v697_v0 = vmax.f32 %v653_v61, 0.0 }
 0x249   :  { %v698_v6 = vmax.f32 %v656_v4, 0.0  ;;  %v1763_v1 = vpop.f32.mrb[16].mxu1 }
 0x24a   :  { %v1764_v8 = vpop.f32.mrb[17].mxu1 }
 0x24b   :  { %v1765_v7 = vadd.f32 %v1764_v8, %v1763_v1  ;;  %v1766_v9 = vpop.f32.mrb[18].mxu1  ;;  %v2731_v12 = vpack.c.bf16 %v698_v6, %v697_v0 }
 0x24c   :  { %v1767_v13 = vpop.f32.mrb[19].mxu1 }
 0x24d   :  { %v661_v15 = vadd.f32 %v1765_v7, %v2709_v63  ;;  %v1768_v14 = vadd.f32 %v1767_v13, %v1766_v9  ;;  %2003 = vmatprep.subr.bf16.mxu0 %v2731_v12 }
 0x24e   :  { %2004 = vmatpush3.bf16.msra.mxu0 %v2731_v12 }
 0x24f   :  { %v664_v16 = vadd.f32 %v1768_v14, %v2709_v63  ;;  %v699_v5 = vmax.f32 %v661_v15, 0.0 }
 0x251   :  { %v700_v17 = vmax.f32 %v664_v16, 0.0  ;;  %v1769_v19 = vpop.f32.mrb[20].mxu1 }
 0x252   :  { %v1770_v21 = vpop.f32.mrb[21].mxu1 }
 0x253   :  { %v1771_v22 = vadd.f32 %v1770_v21, %v1769_v19  ;;  %v1772_v25 = vpop.f32.mrb[22].mxu1  ;;  %v2737_v27 = vpack.c.bf16 %v700_v17, %v699_v5  ;;  %v2146_v5 = vld [vmem:[#allocation7 + $0x40] sm:$0xff]   ;;  %v2148_v19 = vld [vmem:[#allocation7 + $0x48] sm:$0xff]  }
 0x254   :  { %v1773_v28 = vpop.f32.mrb[23].mxu1  ;;  %v2147_v17 = vld [vmem:[#allocation7] sm:$0xff]   ;;  %v2149_v21 = vld [vmem:[#allocation7 + $0x8] sm:$0xff]  }
 0x255   :  { %v669_v29 = vadd.f32 %v1771_v22, %v2709_v63  ;;  %v1774_v2 = vadd.f32 %v1773_v28, %v1772_v25  ;;  %2005 = vmatprep.subr.bf16.mxu0 %v2737_v27  ;;  %v2151_v22 = vld [vmem:[#allocation7 + $0x10] sm:$0xff]   ;;  %v2152_v25 = vld [vmem:[#allocation7 + $0x58] sm:$0xff]  }
 0x256   :  { %2006 = vmatpush3.bf16.msra.mxu0 %v2737_v27  ;;  %v2153_v28 = vld [vmem:[#allocation7 + $0x18] sm:$0xff]  }
 0x257   :  { %v672_v32 = vadd.f32 %v1774_v2, %v2709_v63  ;;  %v701_v33 = vmax.f32 %v669_v29, 0.0  ;;  %v2154_v29 = vld [vmem:[#allocation7 + $0x60] sm:$0xff]   ;;  %v2157_v2 = vld [vmem:[#allocation7 + $0x28] sm:$0xff]  }
 0x259   :  { %v702_v37 = vmax.f32 %v672_v32, 0.0  ;;  %v1775_v38 = vpop.f32.mrb[24].mxu1  ;;  %v2158_v32 = vld [vmem:[#allocation7 + $0x70] sm:$0xff]  }
 0x25a   :  { %v1776_v39 = vpop.f32.mrb[25].mxu1 }
 0x25b   :  { %v1777_v41 = vadd.f32 %v1776_v39, %v1775_v38  ;;  %v1778_v42 = vpop.f32.mrb[26].mxu1  ;;  %v2743_v3 = vpack.c.bf16 %v702_v37, %v701_v33  ;;  %v2159_v33 = vld [vmem:[#allocation7 + $0x30] sm:$0xff]   ;;  %v2160_v37 = vld [vmem:[#allocation7 + $0x78] sm:$0xff]  }
 0x25c   :  { %v1779_v47 = vpop.f32.mrb[27].mxu1  ;;  %v2161_v38 = vld [vmem:[#allocation7 + $0x38] sm:$0xff]  }
 0x25d   :  { %v677_v48 = vadd.f32 %v1777_v41, %v2709_v63  ;;  %v1780_v49 = vadd.f32 %v1779_v47, %v1778_v42  ;;  %2007 = vmatprep.subr.bf16.mxu0 %v2743_v3 }
 0x25e   :  { %2008 = vmatpush3.bf16.msra.mxu0 %v2743_v3 }
 0x25f   :  { %v680_v56 = vadd.f32 %v1780_v49, %v2709_v63  ;;  %v703_v60 = vmax.f32 %v677_v48, 0.0 }
 0x261   :  { %v704_v61 = vmax.f32 %v680_v56, 0.0  ;;  %v1781_v62 = vpop.f32.mrb[28].mxu1 }
 0x262   :  { %v1782_v4 = vpop.f32.mrb[29].mxu1 }
 0x263   :  { %v1783_v0 = vadd.f32 %v1782_v4, %v1781_v62  ;;  %v1784_v6 = vpop.f32.mrb[30].mxu1  ;;  %v2749_v1 = vpack.c.bf16 %v704_v61, %v703_v60 }
 0x264   :  { %v1785_v8 = vpop.f32.mrb[31].mxu1 }
 0x265   :  { %v685_v7 = vadd.f32 %v1783_v0, %v2709_v63  ;;  %v1786_v9 = vadd.f32 %v1785_v8, %v1784_v6  ;;  %2009 = vmatprep.subr.bf16.mxu0 %v2749_v1 }
 0x266   :  { %2010 = vmatpush3.bf16.msra.mxu0 %v2749_v1 }
 0x267   :  { %v688_v13 = vadd.f32 %v1786_v9, %v2709_v63  ;;  %v705_v15 = vmax.f32 %v685_v7, 0.0  ;;  %v2150_v63 = vld [vmem:[#allocation7 + $0x50] sm:$0xff]  }
 0x269   :  { %v706_v14 = vmax.f32 %v688_v13, 0.0 }
 0x26b   :  { %v2755_v16 = vpack.c.bf16 %v706_v14, %v705_v15 }
 0x26d   :  { %2011 = vmatprep.subr.bf16.mxu0 %v2755_v16 }
 0x26e   :  { %2012 = vmatpush3.bf16.msra.mxu0 %v2755_v16 }
 0x26f   :  { %1803 = vmatprep.subr.bf16.mxu0 %v2146_v5 }
 0x271   :  { %2014 = vmatmul.mubr.bf16.vlgmr.msra.gmra.mrb[16].mxu0 %v2558_v20  ;;  %v2155_v20 = vld [vmem:[#allocation7 + $0x20] sm:$0xff]  }
 0x272   :  { %2017 = vmatprep.mubr.bf16.mxu0 %v2569_v24  ;;  %1804 = vmatpush3.bf16.msra.mxu0 %v2147_v17  ;;  %v2156_v24 = vld [vmem:[#allocation7 + $0x68] sm:$0xff]  }
 0x273   :  { %1805 = vmatprep.subr.bf16.mxu0 %v2148_v19 }
 0x276   :  { %1806 = vmatpush3.bf16.msra.mxu0 %v2149_v21 }
 0x277   :  { %1807 = vmatprep.subr.bf16.mxu0 %v2150_v63 }
 0x279   :  { %2018 = vmatmul.mubr.bf16.gmra.mrb[20].mxu0 %v2589_v30 }
 0x27a   :  { %2021 = vmatprep.mubr.bf16.mxu0 %v2600_v34  ;;  %1808 = vmatpush3.bf16.msra.mxu0 %v2151_v22 }
 0x27b   :  { %1809 = vmatprep.subr.bf16.mxu0 %v2152_v25 }
 0x27e   :  { %1810 = vmatpush3.bf16.msra.mxu0 %v2153_v28 }
 0x27f   :  { %1811 = vmatprep.subr.bf16.mxu0 %v2154_v29 }
 0x281   :  { %2022 = vmatmul.mubr.bf16.gmra.mrb[24].mxu0 %v2619_v40 }
 0x282   :  { %2025 = vmatprep.mubr.bf16.mxu0 %v2630_v44  ;;  %1812 = vmatpush3.bf16.msra.mxu0 %v2155_v20 }
 0x283   :  { %1813 = vmatprep.subr.bf16.mxu0 %v2156_v24 }
 0x286   :  { %1814 = vmatpush3.bf16.msra.mxu0 %v2157_v2 }
 0x287   :  { %1815 = vmatprep.subr.bf16.mxu0 %v2158_v32 }
 0x289   :  { %2026 = vmatmul.mubr.bf16.gmra.mrb[28].mxu0 %v2634_v45 }
 0x28a   :  { %1003 = vmatprep.mubr.bf16.mxu0 %v2713_v18  ;;  %1816 = vmatpush3.bf16.msra.mxu0 %v2159_v33 }
 0x28b   :  { %1817 = vmatprep.subr.bf16.mxu0 %v2160_v37 }
 0x28e   :  { %1818 = vmatpush3.bf16.msra.mxu0 %v2161_v38 }
 0x344   :  { %v2015_v39 = vpop.f32.mrb[16].mxu0 }
 0x345   :  { %v749_v41 = vpop.f32.mrb[17].mxu0  ;;  %v814_v47 = vmul.f32 %v2015_v39, %v2652_v51 }
 0x346   :  { %v2016_v42 = vpop.f32.mrb[18].mxu0  ;;  %v812_v56 = vmul.f32 %v749_v41, %v2650_v50 }
 0x347   :  { %v815_v48 = vmul.f32 %v2016_v42, %v2656_v53  ;;  %v752_v49 = vpop.f32.mrb[19].mxu0  ;;  %v2793_v42 = vld [vmem:[%s2939_s8] ss:$0 sm:$0xff] }
 0x348   :  { %v813_v18 = vmul.f32 %v752_v49, %v2654_v52 }
 0x349   :  { %v829_v60 = vpack.c.bf16 %v815_v48, %v814_v47 }
 0x34a   :  { %v828_v61 = vpack.c.bf16 %v813_v18, %v812_v56 }
 0x34c   :  { %v2019_v62 = vpop.f32.mrb[20].mxu0  ;;  %1004 = vmatmul.mubr.bf16.vlgmr.msra.gmra.mrb[32].mxu0 %v828_v61 }
 0x34d   :  { %v765_v4 = vpop.f32.mrb[21].mxu0  ;;  %1011 = vmatprep.mubr.bf16.mxu0 %v2719_v35  ;;  %v818_v6 = vmul.f32 %v2019_v62, %v2662_v57 }
 0x34e   :  { %v2020_v0 = vpop.f32.mrb[22].mxu0  ;;  %v816_v9 = vmul.f32 %v765_v4, %v2658_v54 }
 0x34f   :  { %v819_v8 = vmul.f32 %v2020_v0, %v2664_v59  ;;  %v768_v7 = vpop.f32.mrb[23].mxu0 }
 0x350   :  { %v817_v13 = vmul.f32 %v768_v7, %v2660_v55 }
 0x351   :  { %v831_v15 = vpack.c.bf16 %v819_v8, %v818_v6 }
 0x352   :  { %v830_v14 = vpack.c.bf16 %v817_v13, %v816_v9 }
 0x354   :  { %v2023_v5 = vpop.f32.mrb[24].mxu0  ;;  %1012 = vmatmul.mubr.bf16.gmra.mrb[36].mxu0 %v829_v60 }
 0x355   :  { %v781_v17 = vpop.f32.mrb[25].mxu0  ;;  %1019 = vmatprep.mubr.bf16.mxu0 %v2725_v58  ;;  %v822_v35 = vmul.f32 %v2023_v5, %v2679_v23 }
 0x356   :  { %v2024_v19 = vpop.f32.mrb[26].mxu0  ;;  %v820_v22 = vmul.f32 %v781_v17, %v2670_v10 }
 0x357   :  { %v823_v21 = vmul.f32 %v2024_v19, %v2681_v26  ;;  %v784_v63 = vpop.f32.mrb[27].mxu0 }
 0x358   :  { %v821_v25 = vmul.f32 %v784_v63, %v2672_v11 }
 0x359   :  { %v833_v28 = vpack.c.bf16 %v823_v21, %v822_v35 }
 0x35a   :  { %v832_v29 = vpack.c.bf16 %v821_v25, %v820_v22 }
 0x35c   :  { %v2027_v20 = vpop.f32.mrb[28].mxu0  ;;  %1020 = vmatmul.mubr.bf16.gmra.mrb[40].mxu0 %v830_v14 }
 0x35d   :  { %v797_v24 = vpop.f32.mrb[29].mxu0  ;;  %1027 = vmatprep.mubr.bf16.mxu0 %v2731_v12  ;;  %v826_v58 = vmul.f32 %v2027_v20, %v2692_v43 }
 0x35e   :  { %v2028_v2 = vpop.f32.mrb[30].mxu0  ;;  %v824_v37 = vmul.f32 %v797_v24, %v2684_v31 }
 0x35f   :  { %v827_v32 = vmul.f32 %v2028_v2, %v2695_v46  ;;  %v800_v33 = vpop.f32.mrb[31].mxu0 }
 0x360   :  { %v825_v38 = vmul.f32 %v800_v33, %v2688_v36 }
 0x361   :  { %v835_v39 = vpack.c.bf16 %v827_v32, %v826_v58 }
 0x362   :  { %v834_v41 = vpack.c.bf16 %v825_v38, %v824_v37 }
 0x364   :  { %1028 = vmatmul.mubr.bf16.gmra.mrb[44].mxu0 %v831_v15 }
 0x365   :  { %1035 = vmatprep.mubr.bf16.mxu0 %v2737_v27 }
 0x36c   :  { %1036 = vmatmul.mubr.bf16.gmra.mrb[48].mxu0 %v832_v29 }
 0x36d   :  { %1043 = vmatprep.mubr.bf16.mxu0 %v2743_v3 }
 0x374   :  { %1044 = vmatmul.mubr.bf16.gmra.mrb[52].mxu0 %v833_v28 }
 0x375   :  { %1051 = vmatprep.mubr.bf16.mxu0 %v2749_v1 }
 0x37c   :  { %1052 = vmatmul.mubr.bf16.gmra.mrb[56].mxu0 %v834_v41 }
 0x37d   :  { %1059 = vmatprep.mubr.bf16.mxu0 %v2755_v16 }
 0x384   :  { %1060 = vmatmul.mubr.bf16.gmra.mrb[60].mxu0 %v835_v39 }
 0x41f   :  { %v1819_v12 = vpop.f32.mrb[32].mxu0 }
 0x420   :  { %v1820_v47 = vpop.f32.mrb[33].mxu0 }
 0x421   :  { %v1821_v48 = vadd.f32 %v1820_v47, %v1819_v12  ;;  %v1822_v49 = vpop.f32.mrb[34].mxu0 }
 0x422   :  { %v1823_v27 = vpop.f32.mrb[35].mxu0 }
 0x423   :  { %v1006_v56 = vadd.f32 %v1821_v48, %v2793_v42  ;;  %v1824_v3 = vadd.f32 %v1823_v27, %v1822_v49 }
 0x425   :  { %v1009_v18 = vadd.f32 %v1824_v3, %v2793_v42  ;;  %v1068_v1 = vmax.f32 %v1006_v56, 0.0 }
 0x427   :  { %v1069_v60 = vmax.f32 %v1009_v18, 0.0  ;;  %v1825_v61 = vpop.f32.mrb[36].mxu0 }
 0x428   :  { %v1826_v16 = vpop.f32.mrb[37].mxu0 }
 0x429   :  { %v1827_v62 = vadd.f32 %v1826_v16, %v1825_v61  ;;  %v1828_v4 = vpop.f32.mrb[38].mxu0  ;;  %v2797_v0 = vpack.c.bf16 %v1069_v60, %v1068_v1 }
 0x42a   :  { %v1829_v6 = vpop.f32.mrb[39].mxu0 }
 0x42b   :  { %v1014_v8 = vadd.f32 %v1827_v62, %v2793_v42  ;;  %v1830_v7 = vadd.f32 %v1829_v6, %v1828_v4  ;;  %2029 = vmatprep.subr.bf16.mxu1 %v2797_v0 }
 0x42c   :  { %2030 = vmatpush3.bf16.msra.mxu1 %v2797_v0 }
 0x42d   :  { %v1017_v9 = vadd.f32 %v1830_v7, %v2793_v42  ;;  %v1070_v13 = vmax.f32 %v1014_v8, 0.0 }
 0x42f   :  { %v1071_v15 = vmax.f32 %v1017_v9, 0.0  ;;  %v1831_v14 = vpop.f32.mrb[40].mxu0 }
 0x430   :  { %v1832_v5 = vpop.f32.mrb[41].mxu0 }
 0x431   :  { %v1833_v17 = vadd.f32 %v1832_v5, %v1831_v14  ;;  %v1834_v19 = vpop.f32.mrb[42].mxu0  ;;  %v2803_v35 = vpack.c.bf16 %v1071_v15, %v1070_v13 }
 0x432   :  { %v1835_v21 = vpop.f32.mrb[43].mxu0 }
 0x433   :  { %v1022_v63 = vadd.f32 %v1833_v17, %v2793_v42  ;;  %v1836_v22 = vadd.f32 %v1835_v21, %v1834_v19  ;;  %2031 = vmatprep.subr.bf16.mxu1 %v2803_v35 }
 0x434   :  { %2032 = vmatpush3.bf16.msra.mxu1 %v2803_v35 }
 0x435   :  { %v1025_v25 = vadd.f32 %v1836_v22, %v2793_v42  ;;  %v1072_v28 = vmax.f32 %v1022_v63, 0.0 }
 0x437   :  { %v1073_v29 = vmax.f32 %v1025_v25, 0.0  ;;  %v1837_v20 = vpop.f32.mrb[44].mxu0 }
 0x438   :  { %v1838_v24 = vpop.f32.mrb[45].mxu0 }
 0x439   :  { %v1839_v2 = vadd.f32 %v1838_v24, %v1837_v20  ;;  %v1840_v58 = vpop.f32.mrb[46].mxu0  ;;  %v2809_v32 = vpack.c.bf16 %v1073_v29, %v1072_v28 }
 0x43a   :  { %v1841_v33 = vpop.f32.mrb[47].mxu0 }
 0x43b   :  { %v1030_v37 = vadd.f32 %v1839_v2, %v2793_v42  ;;  %v1842_v38 = vadd.f32 %v1841_v33, %v1840_v58  ;;  %2033 = vmatprep.subr.bf16.mxu1 %v2809_v32 }
 0x43c   :  { %2034 = vmatpush3.bf16.msra.mxu1 %v2809_v32 }
 0x43d   :  { %v1033_v39 = vadd.f32 %v1842_v38, %v2793_v42  ;;  %v1074_v41 = vmax.f32 %v1030_v37, 0.0 }
 0x43f   :  { %v1075_v12 = vmax.f32 %v1033_v39, 0.0  ;;  %v1843_v47 = vpop.f32.mrb[48].mxu0 }
 0x440   :  { %v1844_v48 = vpop.f32.mrb[49].mxu0 }
 0x441   :  { %v1845_v49 = vadd.f32 %v1844_v48, %v1843_v47  ;;  %v1846_v27 = vpop.f32.mrb[50].mxu0  ;;  %v2815_v56 = vpack.c.bf16 %v1075_v12, %v1074_v41 }
 0x442   :  { %v1847_v3 = vpop.f32.mrb[51].mxu0 }
 0x443   :  { %v1038_v18 = vadd.f32 %v1845_v49, %v2793_v42  ;;  %v1848_v1 = vadd.f32 %v1847_v3, %v1846_v27  ;;  %2035 = vmatprep.subr.bf16.mxu1 %v2815_v56 }
 0x444   :  { %2036 = vmatpush3.bf16.msra.mxu1 %v2815_v56 }
 0x445   :  { %v1041_v60 = vadd.f32 %v1848_v1, %v2793_v42  ;;  %v1076_v61 = vmax.f32 %v1038_v18, 0.0  ;;  %v2162_v1 = vld [vmem:[#allocation8 + $0x40] sm:$0xff]  }
 0x447   :  { %v1077_v16 = vmax.f32 %v1041_v60, 0.0  ;;  %v1849_v62 = vpop.f32.mrb[52].mxu0  ;;  %v2163_v60 = vld [vmem:[#allocation8] sm:$0xff]  }
 0x448   :  { %v1850_v4 = vpop.f32.mrb[53].mxu0 }
 0x449   :  { %v1851_v6 = vadd.f32 %v1850_v4, %v1849_v62  ;;  %v1852_v8 = vpop.f32.mrb[54].mxu0  ;;  %v2821_v7 = vpack.c.bf16 %v1077_v16, %v1076_v61  ;;  %v2164_v61 = vld [vmem:[#allocation8 + $0x48] sm:$0xff]   ;;  %v2187_v62 = vld [vmem:[#allocation2 + $0x10] sm:$0xff]  }
 0x44a   :  { %v1853_v9 = vpop.f32.mrb[55].mxu0  ;;  %v2186_v16 = vld [vmem:[#allocation2 + $0x8] sm:$0xff]  }
 0x44b   :  { %v1046_v13 = vadd.f32 %v1851_v6, %v2793_v42  ;;  %v1854_v15 = vadd.f32 %v1853_v9, %v1852_v8  ;;  %2037 = vmatprep.subr.bf16.mxu1 %v2821_v7  ;;  %v2165_v4 = vld [vmem:[#allocation8 + $0x8] sm:$0xff]   ;;  %v2167_v6 = vld [vmem:[#allocation8 + $0x10] sm:$0xff]   ;;  %v2168_v8 = vld [vmem:[#allocation8 + $0x58] sm:$0xff]  }
 0x44c   :  { %2038 = vmatpush3.bf16.msra.mxu1 %v2821_v7  ;;  %v2169_v9 = vld [vmem:[#allocation8 + $0x18] sm:$0xff]  }
 0x44d   :  { %v1049_v14 = vadd.f32 %v1854_v15, %v2793_v42  ;;  %v1078_v5 = vmax.f32 %v1046_v13, 0.0  ;;  %v2170_v13 = vld [vmem:[#allocation8 + $0x60] sm:$0xff]  }
 0x44e   :  { %v2171_v15 = vld [vmem:[#allocation8 + $0x20] sm:$0xff]  }
 0x44f   :  { %v1079_v17 = vmax.f32 %v1049_v14, 0.0  ;;  %v1855_v19 = vpop.f32.mrb[56].mxu0  ;;  %v2172_v14 = vld [vmem:[#allocation8 + $0x68] sm:$0xff]  }
 0x450   :  { %v1856_v21 = vpop.f32.mrb[57].mxu0 }
 0x451   :  { %v1857_v63 = vadd.f32 %v1856_v21, %v1855_v19  ;;  %v1858_v22 = vpop.f32.mrb[58].mxu0  ;;  %v2827_v25 = vpack.c.bf16 %v1079_v17, %v1078_v5  ;;  %v2173_v5 = vld [vmem:[#allocation8 + $0x28] sm:$0xff]   ;;  %v2176_v17 = vld [vmem:[#allocation8 + $0x78] sm:$0xff]  }
 0x452   :  { %v1859_v28 = vpop.f32.mrb[59].mxu0  ;;  %v2177_v19 = vld [vmem:[#allocation8 + $0x38] sm:$0xff]  }
 0x453   :  { %v1054_v29 = vadd.f32 %v1857_v63, %v2793_v42  ;;  %v1860_v20 = vadd.f32 %v1859_v28, %v1858_v22  ;;  %2039 = vmatprep.subr.bf16.mxu1 %v2827_v25 }
 0x454   :  { %2040 = vmatpush3.bf16.msra.mxu1 %v2827_v25 }
 0x455   :  { %v1057_v24 = vadd.f32 %v1860_v20, %v2793_v42  ;;  %v1080_v2 = vmax.f32 %v1054_v29, 0.0 }
 0x457   :  { %v1081_v58 = vmax.f32 %v1057_v24, 0.0  ;;  %v1861_v33 = vpop.f32.mrb[60].mxu0 }
 0x458   :  { %v1862_v37 = vpop.f32.mrb[61].mxu0 }
 0x459   :  { %v1863_v38 = vadd.f32 %v1862_v37, %v1861_v33  ;;  %v1864_v39 = vpop.f32.mrb[62].mxu0  ;;  %v2833_v41 = vpack.c.bf16 %v1081_v58, %v1080_v2 }
 0x45a   :  { %v1865_v12 = vpop.f32.mrb[63].mxu0 }
 0x45b   :  { %v1062_v47 = vadd.f32 %v1863_v38, %v2793_v42  ;;  %v1866_v48 = vadd.f32 %v1865_v12, %v1864_v39  ;;  %2041 = vmatprep.subr.bf16.mxu1 %v2833_v41 }
 0x45c   :  { %2042 = vmatpush3.bf16.msra.mxu1 %v2833_v41 }
 0x45d   :  { %v1065_v49 = vadd.f32 %v1866_v48, %v2793_v42  ;;  %v1082_v27 = vmax.f32 %v1062_v47, 0.0  ;;  %v2166_v42 = vld [vmem:[#allocation8 + $0x50] sm:$0xff]  }
 0x45f   :  { %v1083_v3 = vmax.f32 %v1065_v49, 0.0 }
 0x461   :  { %v2839_v18 = vpack.c.bf16 %v1083_v3, %v1082_v27 }
 0x463   :  { %2043 = vmatprep.subr.bf16.mxu1 %v2839_v18 }
 0x464   :  { %2044 = vmatpush3.bf16.msra.mxu1 %v2839_v18 }
 0x465   :  { %1883 = vmatprep.subr.bf16.mxu1 %v2162_v1 }
 0x467   :  { %2046 = vmatmul.mubr.bf16.vlgmr.msra.gmra.mrb[32].mxu1 %v2186_v16 }
 0x468   :  { %2049 = vmatprep.mubr.bf16.mxu1 %v2187_v62  ;;  %1884 = vmatpush3.bf16.msra.mxu1 %v2163_v60 }
 0x469   :  { %1885 = vmatprep.subr.bf16.mxu1 %v2164_v61 }
 0x46c   :  { %1886 = vmatpush3.bf16.msra.mxu1 %v2165_v4 }
 0x46d   :  { %1887 = vmatprep.subr.bf16.mxu1 %v2166_v42 }
 0x46f   :  { %2050 = vmatmul.mubr.bf16.gmra.mrb[36].mxu1 %v2589_v30  ;;  %v2174_v30 = vld [vmem:[#allocation8 + $0x70] sm:$0xff]  }
 0x470   :  { %2053 = vmatprep.mubr.bf16.mxu1 %v2600_v34  ;;  %1888 = vmatpush3.bf16.msra.mxu1 %v2167_v6  ;;  %v2175_v34 = vld [vmem:[#allocation8 + $0x30] sm:$0xff]  }
 0x471   :  { %1889 = vmatprep.subr.bf16.mxu1 %v2168_v8 }
 0x474   :  { %1890 = vmatpush3.bf16.msra.mxu1 %v2169_v9 }
 0x475   :  { %1891 = vmatprep.subr.bf16.mxu1 %v2170_v13 }
 0x477   :  { %2054 = vmatmul.mubr.bf16.gmra.mrb[40].mxu1 %v2619_v40 }
 0x478   :  { %2057 = vmatprep.mubr.bf16.mxu1 %v2630_v44  ;;  %1892 = vmatpush3.bf16.msra.mxu1 %v2171_v15 }
 0x479   :  { %1893 = vmatprep.subr.bf16.mxu1 %v2172_v14 }
 0x47c   :  { %1894 = vmatpush3.bf16.msra.mxu1 %v2173_v5 }
 0x47d   :  { %1895 = vmatprep.subr.bf16.mxu1 %v2174_v30 }
 0x47f   :  { %2058 = vmatmul.mubr.bf16.gmra.mrb[44].mxu1 %v2634_v45 }
 0x480   :  { %1380 = vmatprep.mubr.bf16.mxu1 %v2797_v0  ;;  %1896 = vmatpush3.bf16.msra.mxu1 %v2175_v34 }
 0x481   :  { %1897 = vmatprep.subr.bf16.mxu1 %v2176_v17 }
 0x484   :  { %1898 = vmatpush3.bf16.msra.mxu1 %v2177_v19 }
 0x53a   :  { %v2047_v21 = vpop.f32.mrb[32].mxu1 }
 0x53b   :  { %v1126_v40 = vpop.f32.mrb[33].mxu1  ;;  %v1191_v44 = vmul.f32 %v2047_v21, %v2652_v51 }
 0x53c   :  { %v2048_v63 = vpop.f32.mrb[34].mxu1  ;;  %v1189_v45 = vmul.f32 %v1126_v40, %v2650_v50 }
 0x53d   :  { %v1192_v22 = vmul.f32 %v2048_v63, %v2656_v53  ;;  %v1129_v28 = vpop.f32.mrb[35].mxu1 }
 0x53e   :  { %v1190_v0 = vmul.f32 %v1129_v28, %v2654_v52 }
 0x53f   :  { %v1206_v29 = vpack.c.bf16 %v1192_v22, %v1191_v44 }
 0x540   :  { %v1205_v20 = vpack.c.bf16 %v1190_v0, %v1189_v45 }
 0x542   :  { %v2051_v24 = vpop.f32.mrb[36].mxu1  ;;  %1381 = vmatmul.mubr.bf16.vlgmr.msra.gmra.mrb[48].mxu1 %v1205_v20 }
 0x543   :  { %v1142_v2 = vpop.f32.mrb[37].mxu1  ;;  %1388 = vmatprep.mubr.bf16.mxu1 %v2803_v35  ;;  %v1195_v33 = vmul.f32 %v2051_v24, %v2662_v57 }
 0x544   :  { %v2052_v58 = vpop.f32.mrb[38].mxu1  ;;  %v1193_v53 = vmul.f32 %v1142_v2, %v2658_v54 }
 0x545   :  { %v1196_v37 = vmul.f32 %v2052_v58, %v2664_v59  ;;  %v1145_v51 = vpop.f32.mrb[39].mxu1 }
 0x546   :  { %v1194_v38 = vmul.f32 %v1145_v51, %v2660_v55 }
 0x547   :  { %v1208_v50 = vpack.c.bf16 %v1196_v37, %v1195_v33 }
 0x548   :  { %v1207_v39 = vpack.c.bf16 %v1194_v38, %v1193_v53 }
 0x54a   :  { %v2055_v52 = vpop.f32.mrb[40].mxu1  ;;  %1389 = vmatmul.mubr.bf16.gmra.mrb[52].mxu1 %v1206_v29 }
 0x54b   :  { %v1158_v12 = vpop.f32.mrb[41].mxu1  ;;  %1396 = vmatprep.mubr.bf16.mxu1 %v2809_v32  ;;  %v1199_v35 = vmul.f32 %v2055_v52, %v2679_v23 }
 0x54c   :  { %v2056_v47 = vpop.f32.mrb[42].mxu1  ;;  %v1197_v59 = vmul.f32 %v1158_v12, %v2670_v10 }
 0x54d   :  { %v1200_v48 = vmul.f32 %v2056_v47, %v2681_v26  ;;  %v1161_v57 = vpop.f32.mrb[43].mxu1 }
 0x54e   :  { %v1198_v49 = vmul.f32 %v1161_v57, %v2672_v11  ;;  %v2336_v11 = vmov 0.0  }
 0x54f   :  { %v1210_v54 = vpack.c.bf16 %v1200_v48, %v1199_v35  ;;  %2061 = vmatprep.subr.bf16.mxu0 %v2336_v11  ;;  %2077 = vmatprep.mubr.msk.bf16.mxu0 %vm2337_vm0, %v2336_v11 }
 0x550   :  { %v1209_v27 = vpack.c.bf16 %v1198_v49, %v1197_v59 }
 0x552   :  { %v2059_v55 = vpop.f32.mrb[44].mxu1  ;;  %1397 = vmatmul.mubr.bf16.gmra.mrb[56].mxu1 %v1207_v39 }
 0x553   :  { %v1174_v3 = vpop.f32.mrb[45].mxu1  ;;  %1404 = vmatprep.mubr.bf16.mxu1 %v2815_v56  ;;  %v1203_v32 = vmul.f32 %v2059_v55, %v2692_v43  ;;  %v2878_v56 = vld [vmem:[%s2941_s10] ss:$0 sm:$0xff] }
 0x554   :  { %v2060_v1 = vpop.f32.mrb[46].mxu1  ;;  %v1201_v26 = vmul.f32 %v1174_v3, %v2684_v31 }
 0x555   :  { %v1204_v60 = vmul.f32 %v2060_v1, %v2695_v46  ;;  %v1177_v23 = vpop.f32.mrb[47].mxu1 }
 0x556   :  { %v1202_v61 = vmul.f32 %v1177_v23, %v2688_v36 }
 0x557   :  { %v1212_v10 = vpack.c.bf16 %v1204_v60, %v1203_v32 }
 0x558   :  { %v1211_v16 = vpack.c.bf16 %v1202_v61, %v1201_v26 }
 0x55a   :  { %1405 = vmatmul.mubr.bf16.gmra.mrb[60].mxu1 %v1208_v50 }
 0x55b   :  { %1412 = vmatprep.mubr.bf16.mxu1 %v2821_v7 }
 0x562   :  { %1413 = vmatmul.mubr.bf16.gmra.mrb[64].mxu1 %v1209_v27 }
 0x563   :  { %1420 = vmatprep.mubr.bf16.mxu1 %v2827_v25 }
 0x56a   :  { %1421 = vmatmul.mubr.bf16.gmra.mrb[68].mxu1 %v1210_v54 }
 0x56b   :  { %1428 = vmatprep.mubr.bf16.mxu1 %v2833_v41 }
 0x572   :  { %1429 = vmatmul.mubr.bf16.gmra.mrb[72].mxu1 %v1211_v16 }
 0x573   :  { %1436 = vmatprep.mubr.bf16.mxu1 %v2839_v18 }
 0x57a   :  { %1437 = vmatmul.mubr.bf16.gmra.mrb[76].mxu1 %v1212_v10 }
 0x615   :  { %v1899_v31 = vpop.f32.mrb[48].mxu1 }
 0x616   :  { %v1900_v36 = vpop.f32.mrb[49].mxu1 }
 0x617   :  { %v1901_v43 = vadd.f32 %v1900_v36, %v1899_v31  ;;  %v1902_v46 = vpop.f32.mrb[50].mxu1 }
 0x618   :  { %v1903_v7 = vpop.f32.mrb[51].mxu1 }
 0x619   :  { %v1904_v25 = vadd.f32 %v1903_v7, %v1902_v46  ;;  %v1383_v41 = vadd.f32 %v1901_v43, %v2878_v56 }
 0x61b   :  { %v1386_v18 = vadd.f32 %v1904_v25, %v2878_v56 }
 0x61d   :  { %v1446_v62 = vpack.c.bf16 %v1386_v18, %v1383_v41  ;;  %v1905_v4 = vpop.f32.mrb[52].mxu1 }
 0x61e   :  { %v1906_v42 = vpop.f32.mrb[53].mxu1 }
 0x61f   :  { %v1907_v6 = vadd.f32 %v1906_v42, %v1905_v4  ;;  %v1908_v8 = vpop.f32.mrb[54].mxu1  ;;  %2062 = vmatpush3.bf16.msra.mxu0 %v1446_v62  ;;  %v1445_v42 = vld [vmem:[%s2934_s3] sm:$0xf] }
 0x620   :  { %v1909_v9 = vpop.f32.mrb[55].mxu1  ;;  %2063 = vmatprep.subr.bf16.mxu0 %v2336_v11 }
 0x621   :  { %v1910_v13 = vadd.f32 %v1909_v9, %v1908_v8  ;;  %v1391_v15 = vadd.f32 %v1907_v6, %v2878_v56  ;;  %v2178_v6 = vld [vmem:[#allocation10] sm:$0xff]   ;;  %v2179_v8 = vld [vmem:[#allocation10 + $0x8] sm:$0xff]   ;;  %v2180_v9 = vld [vmem:[#allocation10 + $0x10] sm:$0xff]  }
 0x623   :  { %v1394_v14 = vadd.f32 %v1910_v13, %v2878_v56  ;;  %v2182_v13 = vld [vmem:[#allocation10 + $0x20] sm:$0xff]  }
 0x625   :  { %v1447_v5 = vpack.c.bf16 %v1394_v14, %v1391_v15  ;;  %v1911_v30 = vpop.f32.mrb[56].mxu1  ;;  %v2183_v15 = vld [vmem:[#allocation10 + $0x28] sm:$0xff]   ;;  %v2184_v14 = vld [vmem:[#allocation10 + $0x30] sm:$0xff]  }
 0x626   :  { %v1912_v34 = vpop.f32.mrb[57].mxu1 }
 0x627   :  { %v1913_v17 = vadd.f32 %v1912_v34, %v1911_v30  ;;  %v1914_v19 = vpop.f32.mrb[58].mxu1  ;;  %2064 = vmatpush3.bf16.msra.mxu0 %v1447_v5  ;;  %v2185_v5 = vld [vmem:[#allocation10 + $0x38] sm:$0xff]   ;;  %v1498_v30 = vpop.permute.xlu0 %1497 }
 0x628   :  { %v1915_v21 = vpop.f32.mrb[59].mxu1  ;;  %2065 = vmatprep.subr.bf16.mxu0 %v2336_v11 }
 0x629   :  { %v1916_v40 = vadd.f32 %v1915_v21, %v1914_v19  ;;  %v1399_v63 = vadd.f32 %v1913_v17, %v2878_v56 }
 0x62b   :  { %v1402_v44 = vadd.f32 %v1916_v40, %v2878_v56 }
 0x62d   :  { %v1448_v22 = vpack.c.bf16 %v1402_v44, %v1399_v63  ;;  %v1917_v28 = vpop.f32.mrb[60].mxu1  ;;  %v1698_v44 = vld [vmem:[%s2943_s12] ss:$0 sm:$0xff] }
 0x62e   :  { %v1918_v45 = vpop.f32.mrb[61].mxu1 }
 0x62f   :  { %v1919_v0 = vadd.f32 %v1918_v45, %v1917_v28  ;;  %v1920_v29 = vpop.f32.mrb[62].mxu1  ;;  %2066 = vmatpush3.bf16.msra.mxu0 %v1448_v22 }
 0x630   :  { %v1921_v20 = vpop.f32.mrb[63].mxu1  ;;  %2067 = vmatprep.subr.bf16.mxu0 %v2336_v11 }
 0x631   :  { %v1922_v24 = vadd.f32 %v1921_v20, %v1920_v29  ;;  %v1407_v2 = vadd.f32 %v1919_v0, %v2878_v56 }
 0x633   :  { %v1410_v58 = vadd.f32 %v1922_v24, %v2878_v56 }
 0x635   :  { %v1449_v33 = vpack.c.bf16 %v1410_v58, %v1407_v2  ;;  %v1923_v37 = vpop.f32.mrb[64].mxu1 }
 0x636   :  { %v1924_v51 = vpop.f32.mrb[65].mxu1 }
 0x637   :  { %v1925_v53 = vadd.f32 %v1924_v51, %v1923_v37  ;;  %v1926_v38 = vpop.f32.mrb[66].mxu1  ;;  %2068 = vmatpush3.bf16.msra.mxu0 %v1449_v33 }
 0x638   :  { %v1927_v50 = vpop.f32.mrb[67].mxu1  ;;  %2069 = vmatprep.subr.bf16.mxu0 %v2336_v11 }
 0x639   :  { %v1928_v39 = vadd.f32 %v1927_v50, %v1926_v38  ;;  %v1415_v52 = vadd.f32 %v1925_v53, %v2878_v56 }
 0x63b   :  { %v1418_v12 = vadd.f32 %v1928_v39, %v2878_v56 }
 0x63d   :  { %v1450_v47 = vpack.c.bf16 %v1418_v12, %v1415_v52  ;;  %v1929_v35 = vpop.f32.mrb[68].mxu1 }
 0x63e   :  { %v1930_v48 = vpop.f32.mrb[69].mxu1 }
 0x63f   :  { %v1931_v57 = vadd.f32 %v1930_v48, %v1929_v35  ;;  %v1932_v59 = vpop.f32.mrb[70].mxu1  ;;  %2070 = vmatpush3.bf16.msra.mxu0 %v1450_v47 }
 0x640   :  { %v1933_v49 = vpop.f32.mrb[71].mxu1  ;;  %2071 = vmatprep.subr.bf16.mxu0 %v2336_v11 }
 0x641   :  { %v1934_v54 = vadd.f32 %v1933_v49, %v1932_v59  ;;  %v1423_v27 = vadd.f32 %v1931_v57, %v2878_v56 }
 0x643   :  { %v1426_v55 = vadd.f32 %v1934_v54, %v2878_v56 }
 0x645   :  { %v1451_v3 = vpack.c.bf16 %v1426_v55, %v1423_v27  ;;  %v1935_v1 = vpop.f32.mrb[72].mxu1 }
 0x646   :  { %v1936_v32 = vpop.f32.mrb[73].mxu1 }
 0x647   :  { %v1937_v60 = vadd.f32 %v1936_v32, %v1935_v1  ;;  %v1938_v23 = vpop.f32.mrb[74].mxu1  ;;  %2072 = vmatpush3.bf16.msra.mxu0 %v1451_v3 }
 0x648   :  { %v1939_v26 = vpop.f32.mrb[75].mxu1  ;;  %2073 = vmatprep.subr.bf16.mxu0 %v2336_v11 }
 0x649   :  { %v1940_v61 = vadd.f32 %v1939_v26, %v1938_v23  ;;  %v1431_v10 = vadd.f32 %v1937_v60, %v2878_v56 }
 0x64b   :  { %v1434_v16 = vadd.f32 %v1940_v61, %v2878_v56 }
 0x64d   :  { %v1452_v31 = vpack.c.bf16 %v1434_v16, %v1431_v10  ;;  %v1941_v36 = vpop.f32.mrb[76].mxu1 }
 0x64e   :  { %v1942_v43 = vpop.f32.mrb[77].mxu1 }
 0x64f   :  { %v1943_v46 = vadd.f32 %v1942_v43, %v1941_v36  ;;  %v1944_v7 = vpop.f32.mrb[78].mxu1  ;;  %2074 = vmatpush3.bf16.msra.mxu0 %v1452_v31 }
 0x650   :  { %v1945_v25 = vpop.f32.mrb[79].mxu1  ;;  %2075 = vmatprep.subr.bf16.mxu0 %v2336_v11 }
 0x651   :  { %v1946_v41 = vadd.f32 %v1945_v25, %v1944_v7  ;;  %v1439_v18 = vadd.f32 %v1943_v46, %v2878_v56 }
 0x653   :  { %v1442_v62 = vadd.f32 %v1946_v41, %v2878_v56  ;;  %v2181_v56 = vld [vmem:[#allocation10 + $0x18] sm:$0xff]  }
 0x655   :  { %v1453_v4 = vpack.c.bf16 %v1442_v62, %v1439_v18 }
 0x657   :  { %2076 = vmatpush3.bf16.msra.mxu0 %v1453_v4 }
 0x658   :  { %2081 = vmatprep.subr.bf16.mxu0 %v2336_v11 }
 0x65a   :  { %2078 = vmatmul.mubr.bf16.vlgmr.msra.gmra.mrb[64].mxu0 %v1445_v42 }
 0x65b   :  { %2082 = vmatpush3.bf16.msra.mxu0 %v2178_v6  ;;  %2097 = vmatprep.mubr.msk.bf16.mxu0 %vm2337_vm0, %v2336_v11 }
 0x65c   :  { %2083 = vmatprep.subr.bf16.mxu0 %v2336_v11 }
 0x65f   :  { %2084 = vmatpush3.bf16.msra.mxu0 %v2179_v8 }
 0x660   :  { %2085 = vmatprep.subr.bf16.mxu0 %v2336_v11 }
 0x663   :  { %2086 = vmatpush3.bf16.msra.mxu0 %v2180_v9 }
 0x664   :  { %2087 = vmatprep.subr.bf16.mxu0 %v2336_v11 }
 0x667   :  { %2088 = vmatpush3.bf16.msra.mxu0 %v2181_v56 }
 0x668   :  { %2089 = vmatprep.subr.bf16.mxu0 %v2336_v11 }
 0x66b   :  { %2090 = vmatpush3.bf16.msra.mxu0 %v2182_v13 }
 0x66c   :  { %2091 = vmatprep.subr.bf16.mxu0 %v2336_v11 }
 0x66f   :  { %2092 = vmatpush3.bf16.msra.mxu0 %v2183_v15 }
 0x670   :  { %2093 = vmatprep.subr.bf16.mxu0 %v2336_v11 }
 0x673   :  { %2094 = vmatpush3.bf16.msra.mxu0 %v2184_v14 }
 0x674   :  { %2095 = vmatprep.subr.bf16.mxu0 %v2336_v11 }
 0x677   :  { %2096 = vmatpush3.bf16.msra.mxu0 %v2185_v5 }
 0x72d   :  { %v1488_v34 = vpop.f32.mrb[64].mxu0 }
 0x72e   :  { %v1500_v17 = vmul.f32 %v1498_v30, %v1488_v34  ;;  %v2079_v19 = vpop.f32.mrb[65].mxu0 }
 0x72f   :  { %v1491_v21 = vpop.f32.mrb[66].mxu0 }
 0x730   :  { %v1501_v40 = vpack.c.bf16 %v1500_v17, %v1500_v17  ;;  %v2080_v63 = vpop.f32.mrb[67].mxu0 }
 0x732   :  { %2098 = vmatmul.mubr.bf16.vlgmr.msra.gmra.mrb[68].mxu0 %v1501_v40 }
 0x805   :  { %v1607_v22 = vpop.f32.mrb[68].mxu0 }
 0x806   :  { %v1608_v28 = vadd.f32 %v1698_v44, %v1607_v22  ;;  %v2099_v45 = vpop.f32.mrb[69].mxu0 }
 0x807   :  { %v1610_v11 = vpop.f32.mrb[70].mxu0 }
 0x808   :  { %1613 = vst [vmem:[#allocation11] sm:$0xff] %v1608_v28  ;;  %v2100_v0 = vpop.f32.mrb[71].mxu0 }
 0x809   :  { %2309 = shalt.err (!%p2306_p2)
}
 0x80a   :  { %s2310_s12 = scalar_lea.hbm %s2944_s13, 128 }
 0x80b   :  { %p2311_p3 = scmp.ne.s32.totalorder %s2944_s13, %s2310_s12  ;;  %p2314_p4 = scmp.lt.u32.totalorder %s2310_s12, %s2944_s13 }
 0x80d   :  { %p2316_p5 = pnand %p2314_p4, %p2311_p3 }
 0x80f   :  { %2319 = shalt.err (!%p2316_p5)
}
 0x810   :  { %1623 = dma.vmem_to_hbm [thread:$0]  %s1621_s19, 128, %s2944_s13, [#allocation4]  }
 0x811   :  { %2326 = dma.done.wait [#allocation4], 128  }
 0x812   :  { %2327 = vsyncadd [#allocation4], 4294967168 }
 0x813   :  { %1627 = vsyncpa [#allocation3], 1 }
 0x814   :  { %1628 = vsyncpa [#allocation6], 1 }
 0x815   :  { %1629 = vsyncpa [#allocation9], 1 }
 0x816   :  { %1630 = vsyncpa [#allocation4], 1 }

</bundles_post_ra>
